<compile_context>
chip_gen: v7x
topology: tpu7x:2x2x1
jax: 0.10.0
libtpu: 0.0.40
codegen_flags: <defaults>
</compile_context>

<pallas_src>
import jax
import jax.numpy as jnp
from jax import lax
from jax.experimental import pallas as pl
from jax.experimental.pallas import tpu as pltpu


def _round_up(x, m):
    return ((x + m - 1) // m) * m


def summary_kernel(xo_ref, bn_ref, w1o_ref, qb_ref, w2p_ref, xn_ref,
                   out_ref, a_ref, s_ref):
    """One grid step = one batch tile of TB rows.

    xo_ref  : (TB, ino)   query features for this batch tile
    bn_ref  : (N, H)      precomputed xn @ W1[ino:] + b1   (batch-invariant)
    w1o_ref : (ino, H)    W1[:ino]
    qb_ref  : (1, N)      0.6 * (bn @ w2)                  (batch-invariant)
    w2p_ref : (1, H)      0.4 * w2 row
    xn_ref  : (N, inn)    node features
    out_ref : (TB, inn)   pooled graph embedding for this batch tile
    a_ref   : (TB, H)     VMEM scratch: query projection
    s_ref   : (TB, N)     VMEM scratch: attention logits
    """
    N, H = bn_ref.shape
    TB = out_ref.shape[0]
    inn = xn_ref.shape[1]
    RB = 8  # row chunk = one f32 sublane group; bounds the (RB, N, H) live set

    # Per-tile query projection: (TB, ino) x (ino, H) on the MXU.
    a_ref[...] = jnp.dot(xo_ref[...], w1o_ref[...],
                         preferred_element_type=jnp.float32)

    bn = bn_ref[...]            # (N, H)   loaded once
    w2p = w2p_ref[...]          # (1, H)
    qb = qb_ref[...]            # (1, N)

    # Attention logits in 8-row chunks so the 3-D intermediate never spills.
    #   leaky_0.2(t) = 0.6*t + 0.4*|t|  (exact); batch-row-constant terms and
    #   b2 are dropped because they cancel in the row softmax.
    def row_chunk(r, carry):
        r0 = pl.multiple_of(r * RB, RB)
        a_c = a_ref[pl.ds(r0, RB), :]                         # (RB, H)
        t = a_c[:, None, :] + bn[None, :, :]                  # (RB, N, H)  VPU
        p = jnp.sum(jnp.abs(t) * w2p[None, :, :], axis=-1)    # (RB, N) lane-reduce
        s_ref[pl.ds(r0, RB), :] = p + qb
        return carry

    lax.fori_loop(0, TB // RB, row_chunk, 0)

    # Row-wise softmax over the node axis.
    s = s_ref[...]                                            # (TB, N)
    m = jnp.max(s, axis=-1, keepdims=True)
    e = jnp.exp(s - m)
    inv_l = pl.reciprocal(jnp.sum(e, axis=-1, keepdims=True), approx=True)

    xn = xn_ref[...]
    if N > inn:
        # Normalize after pooling: scales TB*inn elements instead of TB*N and
        # lets the denominator reduce overlap the MXU matmul.
        out = jnp.dot(e.astype(xn_ref.dtype), xn,
                      preferred_element_type=jnp.float32) * inv_l
    else:
        att = (e * inv_l).astype(xn_ref.dtype)
        out = jnp.dot(att, xn, preferred_element_type=jnp.float32)
    out_ref[...] = out.astype(out_ref.dtype)


def summary_forward(xo, xn, w1, b1, w2, b2, *, tb=None):
    B, ino = xo.shape
    N, inn = xn.shape
    H = w1.shape[1]
    assert w1.shape == (ino + inn, H)
    del b2  # constant logit shift: cancels exactly in the softmax

    # Hoist all batch-invariant work out of the grid loop (one-time XLA ops).
    w1o = w1[:ino]                                   # (ino, H)
    bn = xn @ w1[ino:] + b1.reshape(1, H)            # (N, H)
    w2c = w2.reshape(H)
    qb = (0.6 * (bn @ w2c)).reshape(1, N)            # (1, N)  node-side 0.6*t·w2 term
    w2p = (0.4 * w2c).reshape(1, H)                  # (1, H)  weight for the |t| term

    # Batch tile: large enough to fill MXU sublanes and amortize the ~0.35 us
    # per-grid-step overhead, but keep >= 2 grid steps when B allows so both
    # v7x TensorCores get a shard (dimension_semantics=("parallel",)).
    # On single-TC chips (v5e/v6e) pass tb=B to merge into one step.
    if tb is None:
        tb = 8 if B <= 8 else min(128, _round_up(pl.cdiv(B, 2), 8))
    tb = _round_up(max(1, min(tb, B)), 8)

    # Pad the batch so every tile is full (padded rows are zeros, discarded).
    B_pad = _round_up(B, tb)
    xo_p = xo if B_pad == B else jnp.pad(xo, ((0, B_pad - B), (0, 0)))

    out = pl.pallas_call(
        summary_kernel,
        out_shape=jax.ShapeDtypeStruct((B_pad, inn), xo.dtype),
        grid_spec=pltpu.PrefetchScalarGridSpec(
            num_scalar_prefetch=0,
            grid=(B_pad // tb,),
            in_specs=[
                pl.BlockSpec((tb, ino), lambda b: (b, 0)),   # xo batch tile
                pl.BlockSpec((N, H),    lambda b: (0, 0)),   # bn (invariant)
                pl.BlockSpec((ino, H),  lambda b: (0, 0)),   # W1 (xo part)
                pl.BlockSpec((1, N),    lambda b: (0, 0)),   # 0.6*(bn@w2) row
                pl.BlockSpec((1, H),    lambda b: (0, 0)),   # 0.4*w2 row
                pl.BlockSpec((N, inn),  lambda b: (0, 0)),   # node features
            ],
            out_specs=pl.BlockSpec((tb, inn), lambda b: (b, 0)),
            scratch_shapes=[pltpu.VMEM((tb, H), jnp.float32),
                            pltpu.VMEM((tb, N), jnp.float32)],
        ),
        compiler_params=pltpu.CompilerParams(
            dimension_semantics=("parallel",)),
    )(xo_p, bn, w1o, qb, w2p, xn)

    return out if B_pad == B else out[:B]


def _xavier_uniform(key, fan_in, fan_out, shape):
    bound = (6.0 / (fan_in + fan_out)) ** 0.5
    return jax.random.uniform(key, shape, jnp.float32, -bound, bound)


def _reference(xo, xn, w1, b1, w2, b2):
    # Pure-JAX reference mirroring the PyTorch forward (concat-based).
    B, _ = xo.shape
    N, inn = xn.shape
    xo_e = jnp.broadcast_to(xo[:, None, :], (B, N, xo.shape[1]))
    xn_e = jnp.broadcast_to(xn[None, :, :], (B, N, inn))
    cat = jnp.concatenate([xo_e, xn_e], axis=2).reshape(B * N, -1)
    h = cat @ w1 + b1
    h = jnp.where(h >= 0, h, 0.2 * h)
    scores = (h @ w2.reshape(-1, 1) + b2).reshape(B, N)
    att = jax.nn.softmax(scores, axis=1)
    return jnp.sum(xn_e * att[:, :, None], axis=1)


if __name__ == "__main__":
    # Small shapes consistent with the module: xo:(B, ino), xn:(N, inn).
    # inn=128 keeps the output slab lane-dense; B=64 exercises the tiling
    # heuristic (tb=32, two parallel grid steps).
    B, N, INO, INN, H = 64, 64, 16, 128, 64

    key = jax.random.PRNGKey(0)
    k_xo, k_xn, k_w1, k_w2 = jax.random.split(key, 4)

    xo = jax.random.normal(k_xo, (B, INO), jnp.float32)
    xn = jax.random.normal(k_xn, (N, INN), jnp.float32)

    # Deterministic parameter init (Xavier uniform weights, zero biases),
    # stored already transposed so forward is x @ W + b.
    w1 = _xavier_uniform(k_w1, INO + INN, H, (INO + INN, H))   # Linear(ino+inn, H)
    b1 = jnp.zeros((H,), jnp.float32)
    w2 = _xavier_uniform(k_w2, H, 1, (H, 1))                   # Linear(H, 1)
    b2 = jnp.zeros((1,), jnp.float32)

    out = summary_forward(xo, xn, w1, b1, w2, b2)
    out = jax.block_until_ready(out)

    ref = _reference(xo, xn, w1, b1, w2, b2)
    assert out.shape == (B, INN)
    # Tolerance allows for the approximate-reciprocal softmax normalization.
    max_err = float(jnp.max(jnp.abs(out - ref)))
    assert jnp.allclose(out, ref, atol=5e-3, rtol=5e-3), \
        f"mismatch vs reference (max abs err {max_err})"

    print("KERNEL_OK")
</pallas_src>

<mosaic_0001>
module attributes {stable_mosaic.version = 11 : i64} {
  func.func @summary_kernel(%arg0: i32, %arg1: memref<32x16xf32, #tpu.memory_space<vmem>>, %arg2: memref<64x64xf32, #tpu.memory_space<vmem>>, %arg3: memref<16x64xf32, #tpu.memory_space<vmem>>, %arg4: memref<1x64xf32, #tpu.memory_space<vmem>>, %arg5: memref<1x64xf32, #tpu.memory_space<vmem>>, %arg6: memref<64x128xf32, #tpu.memory_space<vmem>>, %arg7: memref<32x128xf32, #tpu.memory_space<vmem>>, %arg8: memref<32x64xf32, #tpu.memory_space<vmem>>, %arg9: memref<32x64xf32, #tpu.memory_space<vmem>>) attributes {dimension_semantics = [#tpu.dimension_semantics<parallel>], iteration_bounds = array<i64: 2>, scalar_prefetch = 0 : i64, scratch_operands = 2 : i64, tpu.core_type = #tpu.core_type<tc>, window_params = [{transform_indices = @transform_0, window_bounds = array<i64: 32, 16>}, {pipeline_mode = #tpu.pipeline_mode<synchronous>, transform_indices = @transform_1, window_bounds = array<i64: 64, 64>}, {pipeline_mode = #tpu.pipeline_mode<synchronous>, transform_indices = @transform_2, window_bounds = array<i64: 16, 64>}, {pipeline_mode = #tpu.pipeline_mode<synchronous>, transform_indices = @transform_3, window_bounds = array<i64: 1, 64>}, {pipeline_mode = #tpu.pipeline_mode<synchronous>, transform_indices = @transform_4, window_bounds = array<i64: 1, 64>}, {pipeline_mode = #tpu.pipeline_mode<synchronous>, transform_indices = @transform_5, window_bounds = array<i64: 64, 128>}, {transform_indices = @transform_6, window_bounds = array<i64: 32, 128>}]} {
    %c0 = arith.constant 0 : index
    %c0_0 = arith.constant 0 : index
    %0 = vector.load %arg1[%c0, %c0_0] : memref<32x16xf32, #tpu.memory_space<vmem>>, vector<32x16xf32>
    %c0_1 = arith.constant 0 : index
    %c0_2 = arith.constant 0 : index
    %1 = vector.load %arg3[%c0_1, %c0_2] : memref<16x64xf32, #tpu.memory_space<vmem>>, vector<16x64xf32>
    %cst = arith.constant dense<0.000000e+00> : vector<32x64xf32>
    %2 = tpu.matmul %0, %1, %cst {dimension_numbers = #tpu.dot_dimension_numbers<[1], [0], [0], [1], [0, 0, 1, 1], [], []>} : vector<32x16xf32>, vector<16x64xf32>, vector<32x64xf32> -> vector<32x64xf32>
    %c0_3 = arith.constant 0 : index
    %c0_4 = arith.constant 0 : index
    %3 = vector.load %arg8[%c0_3, %c0_4] : memref<32x64xf32, #tpu.memory_space<vmem>>, vector<32x64xf32>
    tpu.vector_store %arg8[%c0_3, %c0_4], %2 {strides = array<i32>} : memref<32x64xf32, #tpu.memory_space<vmem>>, vector<32x64xf32>,
    %c0_5 = arith.constant 0 : index
    %c0_6 = arith.constant 0 : index
    %4 = vector.load %arg2[%c0_5, %c0_6] : memref<64x64xf32, #tpu.memory_space<vmem>>, vector<64x64xf32>
    %c0_7 = arith.constant 0 : index
    %c0_8 = arith.constant 0 : index
    %5 = vector.load %arg5[%c0_7, %c0_8] : memref<1x64xf32, #tpu.memory_space<vmem>>, vector<1x64xf32>
    %c0_9 = arith.constant 0 : index
    %c0_10 = arith.constant 0 : index
    %6 = vector.load %arg4[%c0_9, %c0_10] : memref<1x64xf32, #tpu.memory_space<vmem>>, vector<1x64xf32>
    %c0_i32 = arith.constant 0 : i32
    %c4_i32 = arith.constant 4 : i32
    %7 = arith.addi %c0_i32, %c4_i32 : i32
    %c1_i32 = arith.constant 1 : i32
    scf.for %arg10 = %c0_i32 to %7 step %c1_i32  : i32 {
      %c8_i32 = arith.constant 8 : i32
      %22 = arith.muli %arg10, %c8_i32 : i32
      %23 = tpu.assume_multiple %22, 8 : i32
      %24 = arith.index_cast %23 : i32 to index
      %c0_21 = arith.constant 0 : index
      %25 = vector.load %arg8[%24, %c0_21] : memref<32x64xf32, #tpu.memory_space<vmem>>, vector<8x64xf32>
      %26 = vector.shape_cast %25 : vector<8x64xf32> to vector<8x1x64xf32>
      %27 = vector.shape_cast %4 : vector<64x64xf32> to vector<1x64x64xf32>
      %28 = vector.broadcast %26 : vector<8x1x64xf32> to vector<8x64x64xf32>
      %29 = vector.broadcast %27 : vector<1x64x64xf32> to vector<8x64x64xf32>
      %30 = arith.addf %28, %29 : vector<8x64x64xf32>
      %31 = math.absf %30 : vector<8x64x64xf32>
      %32 = vector.shape_cast %5 : vector<1x64xf32> to vector<1x1x64xf32>
      %33 = vector.broadcast %32 : vector<1x1x64xf32> to vector<8x64x64xf32>
      %34 = arith.mulf %31, %33 : vector<8x64x64xf32>
      %cst_22 = arith.constant dense<0.000000e+00> : vector<8x64xf32>
      %35 = vector.multi_reduction <add>, %34, %cst_22 [2] : vector<8x64x64xf32> to vector<8x64xf32>
      %36 = vector.broadcast %6 : vector<1x64xf32> to vector<8x64xf32>
      %37 = arith.addf %35, %36 : vector<8x64xf32>
      %38 = arith.index_cast %23 : i32 to index
      %c0_23 = arith.constant 0 : index
      %39 = vector.load %arg9[%38, %c0_23] : memref<32x64xf32, #tpu.memory_space<vmem>>, vector<8x64xf32>
      tpu.vector_store %arg9[%38, %c0_23], %37 {strides = array<i32>} : memref<32x64xf32, #tpu.memory_space<vmem>>, vector<8x64xf32>,
    }
    %c4_i32_11 = arith.constant 4 : i32
    %c0_12 = arith.constant 0 : index
    %c0_13 = arith.constant 0 : index
    %8 = vector.load %arg9[%c0_12, %c0_13] : memref<32x64xf32, #tpu.memory_space<vmem>>, vector<32x64xf32>
    %cst_14 = arith.constant dense<0xFF800000> : vector<32xf32>
    %9 = vector.multi_reduction <maximumf>, %8, %cst_14 [1] : vector<32x64xf32> to vector<32xf32>
    %10 = vector.shape_cast %9 : vector<32xf32> to vector<32x1xf32>
    %11 = vector.broadcast %10 : vector<32x1xf32> to vector<32x64xf32>
    %12 = arith.subf %8, %11 : vector<32x64xf32>
    %13 = math.exp %12 : vector<32x64xf32>
    %cst_15 = arith.constant dense<0.000000e+00> : vector<32xf32>
    %14 = vector.multi_reduction <add>, %13, %cst_15 [1] : vector<32x64xf32> to vector<32xf32>
    %15 = vector.shape_cast %14 : vector<32xf32> to vector<32x1xf32>
    %16 = tpu.reciprocal %15 {approx = true} : vector<32x1xf32> -> vector<32x1xf32>
    %c0_16 = arith.constant 0 : index
    %c0_17 = arith.constant 0 : index
    %17 = vector.load %arg6[%c0_16, %c0_17] : memref<64x128xf32, #tpu.memory_space<vmem>>, vector<64x128xf32>
    %18 = vector.broadcast %16 : vector<32x1xf32> to vector<32x64xf32>
    %19 = arith.mulf %13, %18 : vector<32x64xf32>
    %cst_18 = arith.constant dense<0.000000e+00> : vector<32x128xf32>
    %20 = tpu.matmul %19, %17, %cst_18 {dimension_numbers = #tpu.dot_dimension_numbers<[1], [0], [0], [1], [0, 0, 1, 1], [], []>} : vector<32x64xf32>, vector<64x128xf32>, vector<32x128xf32> -> vector<32x128xf32>
    %c0_19 = arith.constant 0 : index
    %c0_20 = arith.constant 0 : index
    %21 = vector.load %arg7[%c0_19, %c0_20] : memref<32x128xf32, #tpu.memory_space<vmem>>, vector<32x128xf32>
    tpu.vector_store %arg7[%c0_19, %c0_20], %20 {strides = array<i32>} : memref<32x128xf32, #tpu.memory_space<vmem>>, vector<32x128xf32>,
    return
  }
  func.func @transform_0(%arg0: i32) -> (i32, i32) {
    %c0_i32 = arith.constant 0 : i32
    %c0_i32_0 = arith.constant 0 : i32
    return %arg0, %c0_i32 : i32, i32
  }
  func.func @transform_1(%arg0: i32) -> (i32, i32) {
    %c0_i32 = arith.constant 0 : i32
    %c0_i32_0 = arith.constant 0 : i32
    %c0_i32_1 = arith.constant 0 : i32
    return %c0_i32, %c0_i32_0 : i32, i32
  }
  func.func @transform_2(%arg0: i32) -> (i32, i32) {
    %c0_i32 = arith.constant 0 : i32
    %c0_i32_0 = arith.constant 0 : i32
    %c0_i32_1 = arith.constant 0 : i32
    return %c0_i32, %c0_i32_0 : i32, i32
  }
  func.func @transform_3(%arg0: i32) -> (i32, i32) {
    %c0_i32 = arith.constant 0 : i32
    %c0_i32_0 = arith.constant 0 : i32
    %c0_i32_1 = arith.constant 0 : i32
    return %c0_i32, %c0_i32_0 : i32, i32
  }
  func.func @transform_4(%arg0: i32) -> (i32, i32) {
    %c0_i32 = arith.constant 0 : i32
    %c0_i32_0 = arith.constant 0 : i32
    %c0_i32_1 = arith.constant 0 : i32
    return %c0_i32, %c0_i32_0 : i32, i32
  }
  func.func @transform_5(%arg0: i32) -> (i32, i32) {
    %c0_i32 = arith.constant 0 : i32
    %c0_i32_0 = arith.constant 0 : i32
    %c0_i32_1 = arith.constant 0 : i32
    return %c0_i32, %c0_i32_0 : i32, i32
  }
  func.func @transform_6(%arg0: i32) -> (i32, i32) {
    %c0_i32 = arith.constant 0 : i32
    %c0_i32_0 = arith.constant 0 : i32
    return %arg0, %c0_i32 : i32, i32
  }
}

</mosaic_0001>

<bundles_post_ra>
// kernel: tpu_custom_call.1
= control target key start
LH: loop header
LB: loop body
LE: loop exit
PB: predicated region body
PF: predicated region fallthrough
CT: control target
= control target key end

     0   :  { %11 = vsyncpa [#allocation5], 0  ;;  %s3111_s0 = inlined_call_operand.vmem [shape: f32[64,16], index: 0, kind: input, shape index: {}]   ;;  %s3112_s1 = inlined_call_operand.vmem [shape: f32[64,64], index: 1, kind: input, shape index: {}]   ;;  %s3113_s2 = inlined_call_operand.vmem [shape: f32[16,64], index: 2, kind: input, shape index: {}]   ;;  %s3114_s3 = inlined_call_operand.vmem [shape: f32[1,64], index: 3, kind: input, shape index: {}]   ;;  %s3115_s4 = inlined_call_operand.vmem [shape: f32[1,64], index: 4, kind: input, shape index: {}]   ;;  %s3116_s5 = inlined_call_operand.hbm [shape: f32[64,128], index: 5, kind: input, shape index: {}]   ;;  %s3117_s6 = inlined_call_operand.hbm [shape: f32[64,128], index: 6, kind: output, shape index: {}]  }
   0x1   :  { %12 = vsyncpa [#allocation6], 0 }
   0x2   :  { %14 = vsyncpa [#allocation6 + $0x1], 0  ;;  %s2165_s21 = smov 0   ;;  %s2167_s22 = smov 0  }
   0x3   :  { %s2169_s23 = smov 0   ;;  %s2171_s24 = smov 0  }
   0x4 LB: > { %s2186_s25 = sadd.s32 4294967295, %s2116_s24   ;;  %s1839_s26 = sadd.s32 4294967294, %s2116_s24   ;;  %s2116_s24 = sphi %s2171_s24, %s3187_s24   ;;  %s2112_s23 = sphi %s2169_s23, %s3186_s23   ;;  %s2108_s22 = sphi %s2167_s22, %s3185_s22   ;;  %s2104_s21 = sphi %s2165_s21, %s3184_s21  }
   0x5   : > { %s2190_s27 = sadd.s32 1, %s2116_s24   ;;  %s158_s28 = sadd.s32 1, %s2112_s23 }
   0x6   : > { %s155_s29 = ssub.s32 %s2116_s24, %s2190_s27  ;;  %p168_p0 = scmp.ne.s32.totalorder %s2112_s23, %s2108_s22 }
   0x7   : > { %p156_p1 = scmp.eq.s32.totalorder %s155_s29, 0  ;;  %p169_p2 = scmp.eq.s32.totalorder %s2186_s25, 1 }
   0x8   : > { %p174_p3 = scmp.ne.s32.totalorder %s2108_s22, %s2104_s21  ;;  %p175_p4 = scmp.eq.s32.totalorder %s1839_s26, 1 }
   0x9   : > { %s2201_s30 = scalar_select %p156_p1, %s2112_s23, %s158_s28  }
   0xa   : > { %p2203_p5 = por %p169_p2, %p168_p0  ;;  %p2207_p6 = por %p175_p4, %p174_p3 }
   0xb   : > { %p1840_p7 = scmp.ge.s32.totalorder %s2116_s24, 1  ;;  %p182_p8 = scmp.lt.s32.totalorder %s2116_s24, 3 }
   0xc   : > { %s3134_s7 = scalar_select %p2203_p5, 1, 0 }
   0xd   : > { %s3135_s8 = scalar_select %p2207_p6, 1, 0 }
   0xe   : > { %p3118_p9 = scmp.eq.s32.totalorder %s2186_s25, 0  ;;  %p2214_p10 = pnand %p1840_p7, %p182_p8 }
   0xf   : > { %s2122_s10 = smov [#allocation4]   ;;  %s2018_s15 = scalar_lea.hbm %s3116_s5, 1024 }
  0x10   : > { %s3136_s9 = scalar_select %p2214_p10, 1, 0 }
  0x11   : > { %s206_s11 = sshll.u32 %s2122_s10, 4  ;;  %p1941_p11 = pneg %p2214_p10  ;;  %s207_s11 = int_to_ptr.vmem [resolvable:$true] %s206_s11 }
  0x12   : > { %p2019_p13 = scmp.ne.s32.totalorder %s3116_s5, %s2018_s15  ;;  %p2025_p3 = scmp.lt.u32.totalorder %s2018_s15, %s3116_s5 }
  0x13   : > { %p2222_p12 = pnand %p3118_p9, %p1941_p11 }
  0x15   : > { %p2020_p0 = pneg %p2222_p12 }
  0x17   : > { %p2021_p1 = pnand %p2020_p0, %p2019_p13 }
  0x19   : > { %p2022_p2 = pneg %p2021_p1 }
  0x1b   : > { %p2027_p4 = pnand %p2025_p3, %p2022_p2 }
  0x1d   : > { %2030 = shalt.err (!%p2027_p4)
}
  0x1e   : > { %s2031_s20 = scalar_lea.vmem %s207_s11, 1024  ;;  %p2039_p9 = scmp.lt.s32.totalorder %s207_s11, %s207_s11 }
  0x1f   : > { %p2032_p7 = scmp.ne.s32.totalorder %s207_s11, %s2031_s20  ;;  %p2040_p6 = scmp.lt.s32.totalorder %s2031_s20, %s2031_s20 }
  0x21   : > { %p2034_p8 = pnand %p2032_p7, %p2020_p0  ;;  %p2041_p5 = por %p2040_p6, %p2039_p9 }
  0x23   : > { %p2035_p11 = pneg %p2034_p8 }
  0x25   : > { %p2042_p10 = pnand %p2041_p5, %p2035_p11 }
  0x27   : > { %2045 = shalt.err (!%p2042_p10)
}
  0x28   : > { %s2123_s26 = smov 128   ;;  %s2124_s28 = smov 8  }
  0x29   : > { %1944 = dma.hbm_to_vmem [thread:$0]  (!%p2222_p12), %s3116_s5, 1024, %s207_s11, [#allocation5], %s2123_s26, %s2123_s26, %s2124_s28  }
  0x2a   : > { %p3138_p13 = scmp.ne.s32.totalorder %s3136_s9, 0 }
  0x2c   : > { %231 = sbr.rel (%p3138_p13) target bundleno = 1395 (0x573), region = 44 }
  0x33   : > { %p3139_p1 = scmp.eq.s32.totalorder %s2186_s25, 0 }
  0x35   : > { %2095 = dma.done.wait (%p3139_p1), [#allocation5], 1024   ;;  %p3140_p0 = pmov %p3139_p1 }
  0x36   : > { %s258_s13 = sand.u32 1, %s2108_s22   ;;  %s1846_s14 = sshll.u32 %s2186_s25, 2  ;;  %v2257_v0 = vld [vmem:[%s3112_s1] sm:$0xff]  ;;  %v2262_v1 = vld [vmem:[%s3112_s1 + $0x8] sm:$0xff]  ;;  %v2267_v2 = vld [vmem:[%s3112_s1 + $0x10] sm:$0xff]  ;;  %vm274_vm0 = vcmask 130048  }
  0x37   : > { %2097 = vsyncadd (%p3140_p0), [#allocation5], 4294966272  ;;  %s2252_s12 = sshll.u32 %s258_s13, 5  ;;  %p262_p5 = scmp.lt.s32.totalorder %s1846_s14, 7  ;;  %3141 = vst [vmem:[#allocation10_spill] sm:$0xff] %v2257_v0  ;;  %v2272_v3 = vld [vmem:[%s3112_s1 + $0x18] sm:$0xff] }
  0x38   : > { %3142 = vst [vmem:[#allocation11_spill] sm:$0xff] %v2262_v1  ;;  %3143 = vst [vmem:[#allocation12_spill] sm:$0xff] %v2267_v2  ;;  %v2277_v4 = vld [vmem:[%s3112_s1 + $0x20] sm:$0xff]  ;;  %v2282_v5 = vld [vmem:[%s3112_s1 + $0x28] sm:$0xff]  ;;  %vm372_vm1 = vcmask 523264   ;;  %s2318_s17 = scalar_lea.vmem [#allocation7], %s2252_s12 }
  0x39   : > { %s3189_s14 = smov (!%p262_p5, %s1846_s14), 7  ;;  %3144 = vst [vmem:[#allocation13_spill] sm:$0xff] %v2272_v3  ;;  %3145 = vst [vmem:[#allocation14_spill] sm:$0xff] %v2277_v4  ;;  %v2290_v6 = vld [vmem:[%s3112_s1 + $0x30] sm:$0xff]  ;;  %v2295_v7 = vld [vmem:[%s3112_s1 + $0x38] sm:$0xff]  ;;  %s2320_s18 = smov 0  }
  0x3a   : > { %s1847_s11 = sshll.u32 %s3189_s14, 3  ;;  %3146 = vst [vmem:[#allocation15_spill] sm:$0xff] %v2282_v5  ;;  %3147 = vst [vmem:[#allocation16_spill] sm:$0xff] %v2290_v6  ;;  %v2300_v8 = vld [vmem:[%s3115_s4] ss:$0 sm:$0xff]  ;;  %v273_v11 = vld [vmem:[%s3113_s2 + $0x8] sm:$0xff] }
  0x3b   : > { %s265_s16 = scalar_lea.vmem %s3111_s0, %s1847_s11  ;;  %3148 = vst [vmem:[#allocation17_spill] sm:$0xff] %v2295_v7  ;;  %3149 = vst [vmem:[#allocation18_spill] sm:$0xff] %v2300_v8  ;;  %v2305_v9 = vld [vmem:[%s3114_s3] ss:$0 sm:$0xff] }
  0x3c   : > { %3150 = vst [vmem:[#allocation19_spill] sm:$0xff] %v2305_v9  ;;  %v272_v10 = vld [vmem:[%s3113_s2] sm:$0xff]  ;;  %v269_v14 = vld [vmem:[%s265_s16 + $0x8] sm:$0xff]  ;;  %v270_v15 = vld [vmem:[%s265_s16 + $0x10] sm:$0xff] }
  0x3d   : > { %v1915_v12 = vpack.c.bf16 %v273_v11, %v272_v10  ;;  %v268_v13 = vld [vmem:[%s265_s16] sm:$0xff]  ;;  %v271_v16 = vld [vmem:[%s265_s16 + $0x18] sm:$0xff] }
  0x3e   : > { %1887 = vmatprep.mubr.msk.f32.mxu0 %vm274_vm0, %v268_v13 }
  0x3f   : > { %1916 = vmatprep.subr.bf16.mxu0 %v1915_v12 }
  0x40   : > { %1918 = vmatpush3.bf16.msra.mxu0 %v1915_v12 }
  0x43   : > { %1888 = vmatmul.mubr.msk.f32.vlgmr.msra.gmra.mrb[0].mxu0 %vm274_vm0, %v269_v14 }
  0x44   : > { %1890 = vmatprep.mubr.msk.f32.mxu0 %vm274_vm0, %v270_v15 }
  0x47   : > { %1891 = vmatmul.mubr.msk.f32.gmra.mrb[2].mxu0 %vm274_vm0, %v271_v16 }
 0x116   : > { %v1889_v17 = vpop.f32.mrb[0].mxu0 }
 0x117   : > { %374 = vst.msk [vmem:[#allocation2 + $0x8] sm:$0xff] %vm372_vm1, %v1889_v17  ;;  %v353_v18 = vpop.f32.mrb[1].mxu0 }
 0x118   : > { %373 = vst.msk [vmem:[#allocation2] sm:$0xff] %vm372_vm1, %v353_v18 }
 0x11a   : > { %v1892_v19 = vpop.f32.mrb[2].mxu0 }
 0x11b   : > { %376 = vst.msk [vmem:[#allocation2 + $0x18] sm:$0xff] %vm372_vm1, %v1892_v19  ;;  %v363_v20 = vpop.f32.mrb[3].mxu0 }
 0x11c   : > { %375 = vst.msk [vmem:[#allocation2 + $0x10] sm:$0xff] %vm372_vm1, %v363_v20 }
 0x11d LB: >> { %v3151_v9 = vld [vmem:[#allocation19_spill] sm:$0xff]  ;;  %v3152_v8 = vld [vmem:[#allocation18_spill] sm:$0xff]  ;;  %v3153_v7 = vld [vmem:[#allocation17_spill] sm:$0xff]  ;;  %v3121_v21 = vlaneseq  ;;  %v2125_v22 = vmov 1966171168   ;;  %s1852_s16 = sshll.u32 %s2120_s18, 3  ;;  %s2120_s18 = sphi %s2320_s18, %s392_s18  }
 0x11e   : >> { %v3154_v6 = vld [vmem:[#allocation16_spill] sm:$0xff]  ;;  %v3155_v5 = vld [vmem:[#allocation15_spill] sm:$0xff]  ;;  %v3156_v4 = vld [vmem:[#allocation14_spill] sm:$0xff]  ;;  %v399_v23 = vunpack.c.l.s4 %v2125_v22  ;;  %s394_s12 = scalar_lea.vmem [#allocation2], %s1852_s16  ;;  %vm1251_vm2 = vcmask 130112   ;;  %vm1258_vm3 = vcmask 195712  }
 0x11f   : >> { %v3157_v3 = vld [vmem:[#allocation13_spill] sm:$0xff]  ;;  %v3158_v2 = vld [vmem:[#allocation12_spill] sm:$0xff]  ;;  %v3159_v1 = vld [vmem:[#allocation11_spill] sm:$0xff]  ;;  %v2327_v24 = vshrl.u32 %v3121_v21, 7  ;;  %vm1265_vm4 = vcmask 261312   ;;  %vm1272_vm5 = vcmask 326912  }
 0x120   : >> { %v3160_v0 = vld [vmem:[#allocation10_spill] sm:$0xff]  ;;  %v400_v25 = vunpack.c.0.s8 %v399_v23  ;;  %vm1279_vm6 = vcmask 392512   ;;  %vm1286_vm7 = vcmask 458112   ;;  %vm1293_vm8 = vcmask 523712   ;;  %s1583_s19 = scalar_lea.vmem [#allocation3], %s1852_s16  ;;  %s392_s18 = sadd.s32 1, %s2120_s18  }
 0x121   : >> { %3161 = vst [vmem:[#allocation20_spill] sm:$0xff] %v2327_v24  ;;  %v2336_v30 = vsub.s32 0, %v2327_v24  ;;  %vm1568_vm9 = vcmask 1041409   ;;  %vm1570_vm10 = vcmask 1042434   ;;  %vm1572_vm11 = vcmask 1043459   ;;  %p389_p6 = scmp.ge.s32.totalorder %s392_s18, 4  }
 0x122   : >> { %v2332_v27 = vsub.s32 %v400_v25, %v2327_v24  ;;  %vm1574_vm12 = vcmask 1044484   ;;  %vm1576_vm13 = vcmask 1045509   ;;  %vm1578_vm14 = vcmask 1046534   ;;  %s1864_s20 = sshll.u32 (%p389_p6), %s2186_s25, 9  ;;  %s1756_s26 = sshll.u32 (%p389_p6), %s2318_s17, 4  ;;  %s3064_s26 = int_to_ptr.vmem [resolvable:$true] %s1756_s26 }
 0x123   : >> { %v395_v26 = vld [vmem:[%s394_s12] sm:$0xff]  ;;  %vm1580_vm15 = vcmask 1047559   ;;  %s3062_s10 = scalar_lea.hbm (%p389_p6), %s3117_s6, %s1864_s20  ;;  %s3070_s25 = scalar_lea.sflag (%p389_p6), [#allocation6], %s258_s13 }
 0x124   : >> { %v397_v28 = vcombine.high %v395_v26, %v395_v26  ;;  %v404_v29 = vrot.slane %v395_v26, %v2332_v27  ;;  %s2046_s11 = scalar_lea.vmem (%p389_p6), %s3064_s26, 512  ;;  %p3182_p10 = scmp.ne.s32.totalorder (%p389_p6), %s3134_s7, 0 }
 0x125   : > { %p2047_p9 = scmp.ne.s32.totalorder (%p389_p6), %s3064_s26, %s2046_s11  ;;  %s2127_s14 = smov (%p389_p6), [#allocation7]  }
 0x126   : >> { %v2339_v31 = vrot.slane %v397_v28, %v2332_v27  ;;  %v2342_v32 = vrot.slane %v404_v29, %v2332_v27  ;;  %v412_v33 = vcombine.high %v404_v29, %v404_v29  ;;  %s2050_s15 = sshll.u32 (%p389_p6), %s2127_s14, 4  ;;  %s2051_s15 = int_to_ptr.vmem [resolvable:$false] %s2050_s15 }
 0x127   : > { %p2048_p12 = pnand (%p389_p6), %p2047_p9, %p3182_p10  ;;  %s2052_s9 = scalar_lea.vmem (%p389_p6), %s2051_s15, 1024 }
 0x128   : >> { %v2346_v34 = vrot.slane %v2339_v31, %v2332_v27  ;;  %v449_v35 = vrot.slane %v2342_v32, %v2336_v30  ;;  %v2355_v37 = vrot.slane %v412_v33, %v2332_v27  ;;  %v442_v22 = vcombine.high %v2342_v32, %v2342_v32  ;;  %p2053_p3 = scmp.lt.s32.totalorder (%p389_p6), %s3064_s26, %s2051_s15  ;;  %p2054_p4 = scmp.lt.s32.totalorder (%p389_p6), %s2052_s9, %s2046_s11 }
 0x129   : > { %p2049_p2 = pneg (%p389_p6), %p2048_p12 }
 0x12a   : >> { %v2352_v36 = vrot.slane %v2346_v34, %v2336_v30  ;;  %v488_v38 = vadd.f32 %v449_v35, %v3158_v2  ;;  %v486_v39 = vadd.f32 %v449_v35, %v3160_v0  ;;  %v489_v40 = vadd.f32 %v449_v35, %v3157_v3  ;;  %p2055_p7 = por (%p389_p6), %p2054_p4, %p2053_p3 }
 0x12b   : >> { %v487_v41 = vadd.f32 %v449_v35, %v3159_v1  ;;  %v491_v42 = vadd.f32 %v449_v35, %v3155_v5  ;;  %v490_v43 = vadd.f32 %v449_v35, %v3156_v4  ;;  %v493_v47 = vadd.f32 %v449_v35, %v3153_v7 }
 0x12c   : >> { %v552_v44 = vand.u32 2147483647, %v488_v38  ;;  %v550_v45 = vand.u32 2147483647, %v486_v39  ;;  %v553_v46 = vand.u32 2147483647, %v489_v40  ;;  %v492_v51 = vadd.f32 %v449_v35, %v3154_v6  ;;  %p2056_p8 = pnand (%p389_p6), %p2055_p7, %p2049_p2 }
 0x12d   : >> { %v551_v48 = vand.u32 2147483647, %v487_v41  ;;  %v555_v49 = vand.u32 2147483647, %v491_v42  ;;  %v554_v50 = vand.u32 2147483647, %v490_v43  ;;  %v453_v55 = vrot.slane %v2355_v37, %v2336_v30 }
 0x12e   : >> { %v622_v52 = vmul.f32 %v3152_v8, %v552_v44  ;;  %v620_v53 = vmul.f32 %v3152_v8, %v550_v45  ;;  %v623_v54 = vmul.f32 %v3152_v8, %v553_v46  ;;  %v557_v61 = vand.u32 2147483647, %v493_v47 }
 0x12f   : >> { %v621_v56 = vmul.f32 %v3152_v8, %v551_v48  ;;  %v625_v59 = vmul.f32 %v3152_v8, %v555_v49  ;;  %v624_v60 = vmul.f32 %v3152_v8, %v554_v50  ;;  %v556_v62 = vand.u32 2147483647, %v492_v51 }
 0x130   : >> { %v690_v57 = vsel %vm372_vm1, %v622_v52, 0.0  ;;  %v684_v58 = vsel %vm372_vm1, %v620_v53, 0.0  ;;  %v693_v63 = vsel %vm372_vm1, %v623_v54, 0.0  ;;  %v495_v11 = vadd.f32 %v453_v55, %v3159_v1 }
 0x131   : >> { %691 = vadd.xlane.f32.xlu1 %v690_v57  ;;  %685 = vadd.xlane.f32.xlu0 %v684_v58  ;;  %v687_v10 = vsel %vm372_vm1, %v621_v56, 0.0  ;;  %v494_v12 = vadd.f32 %v453_v55, %v3160_v0  ;;  %v699_v13 = vsel %vm372_vm1, %v625_v59, 0.0  ;;  %v696_v14 = vsel %vm372_vm1, %v624_v60, 0.0 }
 0x132   : >> { %v627_v15 = vmul.f32 %v3152_v8, %v557_v61  ;;  %v626_v16 = vmul.f32 %v3152_v8, %v556_v62  ;;  %v559_v17 = vand.u32 2147483647, %v495_v11  ;;  %v497_v19 = vadd.f32 %v453_v55, %v3157_v3 }
 0x133   : >> { %v558_v18 = vand.u32 2147483647, %v494_v12  ;;  %v496_v20 = vadd.f32 %v453_v55, %v3158_v2  ;;  %v499_v26 = vadd.f32 %v453_v55, %v3155_v5  ;;  %v498_v28 = vadd.f32 %v453_v55, %v3156_v4 }
 0x134   : >> { %v705_v23 = vsel %vm372_vm1, %v627_v15, 0.0  ;;  %v702_v25 = vsel %vm372_vm1, %v626_v16, 0.0  ;;  %v629_v29 = vmul.f32 %v3152_v8, %v559_v17  ;;  %v561_v35 = vand.u32 2147483647, %v497_v19 }
 0x135   : >> { %694 = vadd.xlane.f32.xlu1 %v693_v63  ;;  %688 = vadd.xlane.f32.xlu0 %v687_v10  ;;  %v628_v33 = vmul.f32 %v3152_v8, %v558_v18  ;;  %v560_v38 = vand.u32 2147483647, %v496_v20  ;;  %v501_v39 = vadd.f32 %v453_v55, %v3153_v7  ;;  %v563_v32 = vand.u32 2147483647, %v499_v26 }
 0x136   : >> { %v562_v40 = vand.u32 2147483647, %v498_v28  ;;  %v500_v41 = vadd.f32 %v453_v55, %v3154_v6  ;;  %v457_v42 = vrot.slane %v442_v22, %v2336_v30  ;;  %v711_v43 = vsel %vm372_vm1, %v629_v29, 0.0 }
 0x137   : >> { %v708_v44 = vsel %vm372_vm1, %v628_v33, 0.0  ;;  %v631_v45 = vmul.f32 %v3152_v8, %v561_v35  ;;  %v630_v46 = vmul.f32 %v3152_v8, %v560_v38  ;;  %v565_v47 = vand.u32 2147483647, %v501_v39 }
 0x138   : >> { %v633_v48 = vmul.f32 %v3152_v8, %v563_v32  ;;  %v632_v49 = vmul.f32 %v3152_v8, %v562_v40  ;;  %v564_v50 = vand.u32 2147483647, %v500_v41  ;;  %v503_v53 = vadd.f32 %v457_v42, %v3159_v1 }
 0x139   : >> { %700 = vadd.xlane.f32.xlu1 %v699_v13  ;;  %697 = vadd.xlane.f32.xlu0 %v696_v14  ;;  %v717_v51 = vsel %vm372_vm1, %v631_v45, 0.0  ;;  %v714_v52 = vsel %vm372_vm1, %v630_v46, 0.0  ;;  %v502_v54 = vadd.f32 %v457_v42, %v3160_v0  ;;  %v635_v55 = vmul.f32 %v3152_v8, %v565_v47 }
 0x13a   : >> { %v723_v56 = vsel %vm372_vm1, %v633_v48, 0.0  ;;  %v634_v57 = vmul.f32 %v3152_v8, %v564_v50  ;;  %v505_v58 = vadd.f32 %v457_v42, %v3157_v3  ;;  %v720_v59 = vsel %vm372_vm1, %v632_v49, 0.0 }
 0x13b   : >> { %v567_v60 = vand.u32 2147483647, %v503_v53  ;;  %v566_v61 = vand.u32 2147483647, %v502_v54  ;;  %v504_v62 = vadd.f32 %v457_v42, %v3158_v2  ;;  %v729_v63 = vsel %vm372_vm1, %v635_v55, 0.0 }
 0x13c   : >> { %v413_v10 = vcombine.high %v2339_v31, %v2339_v31  ;;  %v726_v11 = vsel %vm372_vm1, %v634_v57, 0.0  ;;  %v569_v12 = vand.u32 2147483647, %v505_v58  ;;  %v507_v13 = vadd.f32 %v457_v42, %v3155_v5 }
 0x13d   : >> { %706 = vadd.xlane.f32.xlu1 %v705_v23  ;;  %703 = vadd.xlane.f32.xlu0 %v702_v25  ;;  %v506_v14 = vadd.f32 %v457_v42, %v3156_v4  ;;  %v637_v15 = vmul.f32 %v3152_v8, %v567_v60  ;;  %v636_v16 = vmul.f32 %v3152_v8, %v566_v61  ;;  %v568_v17 = vand.u32 2147483647, %v504_v62 }
 0x13e   : >> { %v444_v18 = vcombine.high %v2355_v37, %v2355_v37  ;;  %v509_v19 = vadd.f32 %v457_v42, %v3153_v7  ;;  %v2424_v31 = vrot.slane %v413_v10, %v2332_v27  ;;  %v443_v20 = vcombine.high %v2346_v34, %v2346_v34 }
 0x13f   : >> { %v639_v22 = vmul.f32 %v3152_v8, %v569_v12  ;;  %v571_v23 = vand.u32 2147483647, %v507_v13  ;;  %v570_v25 = vand.u32 2147483647, %v506_v14  ;;  %v508_v26 = vadd.f32 %v457_v42, %v3154_v6 }
 0x140   : >> { %v735_v28 = vsel %vm372_vm1, %v637_v15, 0.0  ;;  %v732_v37 = vsel %vm372_vm1, %v636_v16, 0.0  ;;  %v638_v29 = vmul.f32 %v3152_v8, %v568_v17  ;;  %v461_v27 = vrot.slane %v444_v18, %v2336_v30 }
 0x141   : >> { %712 = vadd.xlane.f32.xlu1 %v711_v43  ;;  %709 = vadd.xlane.f32.xlu0 %v708_v44  ;;  %v573_v33 = vand.u32 2147483647, %v509_v19  ;;  %v2436_v34 = vrot.slane %v2424_v31, %v2336_v30  ;;  %v641_v35 = vmul.f32 %v3152_v8, %v571_v23  ;;  %v640_v38 = vmul.f32 %v3152_v8, %v570_v25 }
 0x142   : >> { %v572_v39 = vand.u32 2147483647, %v508_v26  ;;  %v2441_v32 = vrot.slane %v443_v20, %v2336_v30  ;;  %v741_v40 = vsel %vm372_vm1, %v639_v22, 0.0  ;;  %v738_v41 = vsel %vm372_vm1, %v638_v29, 0.0 }
 0x143   : >> { %v511_v42 = vadd.f32 %v461_v27, %v3159_v1  ;;  %v510_v43 = vadd.f32 %v461_v27, %v3160_v0  ;;  %v747_v44 = vsel %vm372_vm1, %v641_v35, 0.0  ;;  %v744_v45 = vsel %vm372_vm1, %v640_v38, 0.0 }
 0x144   : >> { %v643_v46 = vmul.f32 %v3152_v8, %v573_v33  ;;  %v642_v47 = vmul.f32 %v3152_v8, %v572_v39  ;;  %v513_v50 = vadd.f32 %v461_v27, %v3157_v3  ;;  %v515_v54 = vadd.f32 %v461_v27, %v3155_v5 }
 0x145   : >> { %718 = vadd.xlane.f32.xlu1 %v717_v51  ;;  %715 = vadd.xlane.f32.xlu0 %v714_v52  ;;  %v575_v48 = vand.u32 2147483647, %v511_v42  ;;  %v574_v49 = vand.u32 2147483647, %v510_v43  ;;  %v512_v51 = vadd.f32 %v461_v27, %v3158_v2  ;;  %v514_v55 = vadd.f32 %v461_v27, %v3156_v4 }
 0x146   : >> { %v753_v52 = vsel %vm372_vm1, %v643_v46, 0.0  ;;  %v750_v53 = vsel %vm372_vm1, %v642_v47, 0.0  ;;  %v577_v58 = vand.u32 2147483647, %v513_v50  ;;  %v579_v60 = vand.u32 2147483647, %v515_v54 }
 0x147   : >> { %v644_v57 = vmul.f32 %v3152_v8, %v574_v49  ;;  %v578_v61 = vand.u32 2147483647, %v514_v55  ;;  %v517_v62 = vadd.f32 %v461_v27, %v3153_v7  ;;  %v519_v14 = vadd.f32 %v2352_v36, %v3159_v1 }
 0x148   : >> { %v647_v12 = vmul.f32 %v3152_v8, %v577_v58  ;;  %v649_v15 = vmul.f32 %v3152_v8, %v579_v60  ;;  %v518_v18 = vadd.f32 %v2352_v36, %v3160_v0  ;;  %v445_v23 = vcombine.high %v2424_v31, %v2424_v31 }
 0x149   : >> { %724 = vadd.xlane.f32.xlu1 %v723_v56  ;;  %721 = vadd.xlane.f32.xlu0 %v720_v59  ;;  %v645_v56 = vmul.f32 %v3152_v8, %v575_v48  ;;  %v576_v59 = vand.u32 2147483647, %v512_v51  ;;  %v648_v16 = vmul.f32 %v3152_v8, %v578_v61  ;;  %v581_v17 = vand.u32 2147483647, %v517_v62 }
 0x14a   : >> { %v765_v19 = vsel %vm372_vm1, %v647_v12, 0.0  ;;  %v2476_v25 = vrot.slane %v445_v23, %v2336_v30  ;;  %v583_v26 = vand.u32 2147483647, %v519_v14  ;;  %v520_v29 = vadd.f32 %v2352_v36, %v3158_v2 }
 0x14b   : >> { %v759_v10 = vsel %vm372_vm1, %v645_v56, 0.0  ;;  %v646_v13 = vmul.f32 %v3152_v8, %v576_v59  ;;  %v768_v33 = vsel %vm372_vm1, %v648_v16, 0.0  ;;  %v651_v35 = vmul.f32 %v3152_v8, %v581_v17 }
 0x14c   : >> { %v584_v38 = vand.u32 2147483647, %v520_v29  ;;  %v523_v39 = vadd.f32 %v2352_v36, %v3155_v5  ;;  %v653_v43 = vmul.f32 %v3152_v8, %v583_v26  ;;  %v525_v48 = vadd.f32 %v2352_v36, %v3153_v7 }
 0x14d   : >> { %730 = vadd.xlane.f32.xlu1 %v729_v63  ;;  %727 = vadd.xlane.f32.xlu0 %v726_v11  ;;  %v516_v63 = vadd.f32 %v461_v27, %v3154_v6  ;;  %v756_v11 = vsel %vm372_vm1, %v644_v57, 0.0  ;;  %v762_v20 = vsel %vm372_vm1, %v646_v13, 0.0  ;;  %v771_v27 = vsel %vm372_vm1, %v649_v15, 0.0 }
 0x14e   : >> { %v587_v46 = vand.u32 2147483647, %v523_v39  ;;  %v783_v49 = vsel %vm372_vm1, %v653_v43, 0.0  ;;  %v654_v51 = vmul.f32 %v3152_v8, %v584_v38  ;;  %v589_v56 = vand.u32 2147483647, %v525_v48 }
 0x14f   : >> { %v580_v22 = vand.u32 2147483647, %v516_v63  ;;  %v527_v59 = vadd.f32 %v2436_v34, %v3159_v1  ;;  %v526_v60 = vadd.f32 %v2436_v34, %v3160_v0  ;;  %v529_v63 = vadd.f32 %v2436_v34, %v3157_v3 }
 0x150   : >> { %v657_v54 = vmul.f32 %v3152_v8, %v587_v46  ;;  %v786_v57 = vsel %vm372_vm1, %v654_v51, 0.0  ;;  %v659_v62 = vmul.f32 %v3152_v8, %v589_v56  ;;  %v528_v13 = vadd.f32 %v2436_v34, %v3158_v2 }
 0x151   : >> { %736 = vadd.xlane.f32.xlu1 %v735_v28  ;;  %733 = vadd.xlane.f32.xlu0 %v732_v37  ;;  %v582_v28 = vand.u32 2147483647, %v518_v18  ;;  %v521_v37 = vadd.f32 %v2352_v36, %v3157_v3  ;;  %v650_v31 = vmul.f32 %v3152_v8, %v580_v22  ;;  %v590_v12 = vand.u32 2147483647, %v526_v60 }
 0x152   : >> { %v801_v14 = vsel %vm372_vm1, %v659_v62, 0.0  ;;  %v593_v15 = vand.u32 2147483647, %v529_v63  ;;  %v531_v16 = vadd.f32 %v2436_v34, %v3155_v5  ;;  %v530_v17 = vadd.f32 %v2436_v34, %v3156_v4 }
 0x153   : >> { %v585_v30 = vand.u32 2147483647, %v521_v37  ;;  %v774_v42 = vsel %vm372_vm1, %v650_v31, 0.0  ;;  %v592_v22 = vand.u32 2147483647, %v528_v13  ;;  %v533_v37 = vadd.f32 %v2436_v34, %v3153_v7 }
 0x154   : >> { %v663_v23 = vmul.f32 %v3152_v8, %v593_v15  ;;  %v595_v26 = vand.u32 2147483647, %v531_v16  ;;  %v534_v43 = vadd.f32 %v2441_v32, %v3160_v0  ;;  %v537_v46 = vadd.f32 %v2441_v32, %v3157_v3 }
 0x155   : >> { %742 = vadd.xlane.f32.xlu1 %v741_v40  ;;  %739 = vadd.xlane.f32.xlu0 %v738_v41  ;;  %v522_v40 = vadd.f32 %v2352_v36, %v3156_v4  ;;  %v777_v41 = vsel %vm372_vm1, %v651_v35, 0.0  ;;  %v532_v35 = vadd.f32 %v2436_v34, %v3154_v6  ;;  %v597_v39 = vand.u32 2147483647, %v533_v37 }
 0x156   : >> { %v813_v31 = vsel %vm372_vm1, %v663_v23, 0.0  ;;  %v545_v37 = vadd.f32 %v2476_v25, %v3157_v3 }
 0x157   : >> { %v586_v47 = vand.u32 2147483647, %v522_v40 }
 0x159   : >> { %748 = vadd.xlane.f32.xlu1 %v747_v44  ;;  %745 = vadd.xlane.f32.xlu0 %v744_v45  ;;  %v652_v44 = vmul.f32 %v3152_v8, %v582_v28  ;;  %v655_v45 = vmul.f32 %v3152_v8, %v585_v30  ;;  %v656_v55 = vmul.f32 %v3152_v8, %v586_v47  ;;  %v594_v28 = vand.u32 2147483647, %v530_v17 }
 0x15a   : >> { %v665_v30 = vmul.f32 %v3152_v8, %v595_v26  ;;  %v543_v17 = vadd.f32 %v2476_v25, %v3159_v1 }
 0x15b   : >> { %v780_v50 = vsel %vm372_vm1, %v652_v44, 0.0  ;;  %v792_v61 = vsel %vm372_vm1, %v656_v55, 0.0  ;;  %v664_v38 = vmul.f32 %v3152_v8, %v594_v28 }
 0x15c   : >> { %v819_v34 = vsel %vm372_vm1, %v665_v30, 0.0  ;;  %v607_v26 = vand.u32 2147483647, %v543_v17 }
 0x15d   : >> { %754 = vadd.xlane.f32.xlu1 %v753_v52  ;;  %751 = vadd.xlane.f32.xlu0 %v750_v53  ;;  %v524_v52 = vadd.f32 %v2352_v36, %v3154_v6  ;;  %v789_v53 = vsel %vm372_vm1, %v655_v45, 0.0  ;;  %v795_v36 = vsel %vm372_vm1, %v657_v54, 0.0  ;;  %v816_v44 = vsel %vm372_vm1, %v664_v38, 0.0 }
 0x15e   : >> { %v667_v45 = vmul.f32 %v3152_v8, %v597_v39  ;;  %v538_v54 = vadd.f32 %v2441_v32, %v3156_v4  ;;  %v677_v30 = vmul.f32 %v3152_v8, %v607_v26  ;;  %v609_v39 = vand.u32 2147483647, %v545_v37 }
 0x15f   : >> { %v588_v58 = vand.u32 2147483647, %v524_v52  ;;  %v601_v52 = vand.u32 2147483647, %v537_v46 }
 0x160   : >> { %v825_v51 = vsel %vm372_vm1, %v667_v45, 0.0  ;;  %v602_v60 = vand.u32 2147483647, %v538_v54  ;;  %v679_v46 = vmul.f32 %v3152_v8, %v609_v39 }
 0x161   : >> { %760 = vadd.xlane.f32.xlu1 %v759_v10  ;;  %757 = vadd.xlane.f32.xlu0 %v756_v11  ;;  %v658_v10 = vmul.f32 %v3152_v8, %v588_v58  ;;  %v591_v11 = vand.u32 2147483647, %v527_v59 }
 0x162   : >> { %v672_v13 = vmul.f32 %v3152_v8, %v602_v60 }
 0x163   : >> { %v798_v18 = vsel %vm372_vm1, %v658_v10, 0.0  ;;  %v671_v10 = vmul.f32 %v3152_v8, %v601_v52 }
 0x165   : >> { %766 = vadd.xlane.f32.xlu1 %v765_v19  ;;  %763 = vadd.xlane.f32.xlu0 %v762_v20  ;;  %v661_v19 = vmul.f32 %v3152_v8, %v591_v11  ;;  %v660_v20 = vmul.f32 %v3152_v8, %v590_v12  ;;  %v837_v16 = vsel %vm372_vm1, %v671_v10, 0.0 }
 0x167   : >> { %v807_v29 = vsel %vm372_vm1, %v661_v19, 0.0 }
 0x169   : >> { %772 = vadd.xlane.f32.xlu1 %v771_v27  ;;  %769 = vadd.xlane.f32.xlu0 %v768_v33  ;;  %v804_v27 = vsel %vm372_vm1, %v660_v20, 0.0  ;;  %v662_v33 = vmul.f32 %v3152_v8, %v592_v22  ;;  %v840_v20 = vsel %vm372_vm1, %v672_v13, 0.0 }
 0x16b   : >> { %v810_v40 = vsel %vm372_vm1, %v662_v33, 0.0 }
 0x16d   : >> { %778 = vadd.xlane.f32.xlu1 %v777_v41  ;;  %775 = vadd.xlane.f32.xlu0 %v774_v42  ;;  %v596_v41 = vand.u32 2147483647, %v532_v35  ;;  %v535_v42 = vadd.f32 %v2441_v32, %v3159_v1  ;;  %v547_v35 = vadd.f32 %v2476_v25, %v3155_v5 }
 0x16f   : >> { %v666_v47 = vmul.f32 %v3152_v8, %v596_v41  ;;  %v599_v48 = vand.u32 2147483647, %v535_v42  ;;  %v611_v41 = vand.u32 2147483647, %v547_v35 }
 0x171   : >> { %784 = vadd.xlane.f32.xlu1 %v783_v49  ;;  %781 = vadd.xlane.f32.xlu0 %v780_v50  ;;  %v598_v49 = vand.u32 2147483647, %v534_v43  ;;  %v536_v50 = vadd.f32 %v2441_v32, %v3158_v2  ;;  %v822_v55 = vsel %vm372_vm1, %v666_v47, 0.0  ;;  %v669_v56 = vmul.f32 %v3152_v8, %v599_v48 }
 0x172   : >> { %v549_v43 = vadd.f32 %v2476_v25, %v3153_v7  ;;  %v681_v48 = vmul.f32 %v3152_v8, %v611_v41 }
 0x173   : >> { %v600_v58 = vand.u32 2147483647, %v536_v50  ;;  %v831_v62 = vsel %vm372_vm1, %v669_v56, 0.0  ;;  %v861_v50 = vsel %vm372_vm1, %v679_v46, 0.0 }
 0x175   : >> { %790 = vadd.xlane.f32.xlu1 %v789_v53  ;;  %787 = vadd.xlane.f32.xlu0 %v786_v57  ;;  %v539_v53 = vadd.f32 %v2441_v32, %v3155_v5  ;;  %v668_v57 = vmul.f32 %v3152_v8, %v598_v49  ;;  %v670_v11 = vmul.f32 %v3152_v8, %v600_v58  ;;  %v613_v49 = vand.u32 2147483647, %v549_v43 }
 0x177   : >> { %v603_v59 = vand.u32 2147483647, %v539_v53  ;;  %v828_v63 = vsel %vm372_vm1, %v668_v57, 0.0  ;;  %v867_v53 = vsel %vm372_vm1, %v681_v48, 0.0 }
 0x179   : >> { %796 = vadd.xlane.f32.xlu1 %v795_v36  ;;  %793 = vadd.xlane.f32.xlu0 %v792_v61  ;;  %v541_v36 = vadd.f32 %v2441_v32, %v3153_v7  ;;  %v540_v61 = vadd.f32 %v2441_v32, %v3154_v6  ;;  %v673_v12 = vmul.f32 %v3152_v8, %v603_v59  ;;  %v834_v32 = vsel %vm372_vm1, %v670_v11, 0.0 }
 0x17b   : >> { %v604_v15 = vand.u32 2147483647, %v540_v61  ;;  %v843_v19 = vsel %vm372_vm1, %v673_v12, 0.0 }
 0x17d   : >> { %802 = vadd.xlane.f32.xlu1 %v801_v14  ;;  %799 = vadd.xlane.f32.xlu0 %v798_v18  ;;  %v605_v14 = vand.u32 2147483647, %v541_v36  ;;  %v542_v18 = vadd.f32 %v2476_v25, %v3160_v0  ;;  %v674_v23 = vmul.f32 %v3152_v8, %v604_v15  ;;  %v2126_v36 = vmov 0  }
 0x17e   : >> { %2000 = vset.pattern.permute.xlu1 %v2126_v36  ;;  %1999 = vset.pattern.permute.xlu0 %v2126_v36 }
 0x17f   : >> { %v675_v22 = vmul.f32 %v3152_v8, %v605_v14  ;;  %v606_v28 = vand.u32 2147483647, %v542_v18  ;;  %v846_v33 = vsel %vm372_vm1, %v674_v23, 0.0 }
 0x181   : >> { %808 = vadd.xlane.f32.xlu1 %v807_v29  ;;  %805 = vadd.xlane.f32.xlu0 %v804_v27  ;;  %v544_v29 = vadd.f32 %v2476_v25, %v3158_v2  ;;  %v849_v27 = vsel %vm372_vm1, %v675_v22, 0.0  ;;  %v676_v38 = vmul.f32 %v3152_v8, %v606_v28 }
 0x183   : >> { %v852_v45 = vsel %vm372_vm1, %v676_v38, 0.0 }
 0x185   : >> { %814 = vadd.xlane.f32.xlu1 %v813_v31  ;;  %811 = vadd.xlane.f32.xlu0 %v810_v40  ;;  %v546_v31 = vadd.f32 %v2476_v25, %v3156_v4  ;;  %v608_v40 = vand.u32 2147483647, %v544_v29 }
 0x187   : >> { %v610_v42 = vand.u32 2147483647, %v546_v31  ;;  %v678_v47 = vmul.f32 %v3152_v8, %v608_v40 }
 0x189   : >> { %820 = vadd.xlane.f32.xlu1 %v819_v34  ;;  %817 = vadd.xlane.f32.xlu0 %v816_v44  ;;  %v548_v34 = vadd.f32 %v2476_v25, %v3154_v6  ;;  %v855_v44 = vsel %vm372_vm1, %v677_v30, 0.0  ;;  %v680_v52 = vmul.f32 %v3152_v8, %v610_v42 }
 0x18b   : >> { %v612_v25 = vand.u32 2147483647, %v548_v34  ;;  %v864_v54 = vsel %vm372_vm1, %v680_v52, 0.0 }
 0x18d   : >> { %826 = vadd.xlane.f32.xlu1 %v825_v51  ;;  %823 = vadd.xlane.f32.xlu0 %v822_v55  ;;  %v858_v51 = vsel %vm372_vm1, %v678_v47, 0.0  ;;  %v683_v55 = vmul.f32 %v3152_v8, %v613_v49  ;;  %v682_v56 = vmul.f32 %v3152_v8, %v612_v25 }
 0x18f   : >> { %v873_v57 = vsel %vm372_vm1, %v683_v55, 0.0  ;;  %v870_v58 = vsel %vm372_vm1, %v682_v56, 0.0 }
 0x191   : >> { %832 = vadd.xlane.f32.xlu1 %v831_v62  ;;  %829 = vadd.xlane.f32.xlu0 %v828_v63 }
 0x195   : >> { %838 = vadd.xlane.f32.xlu1 %v837_v16  ;;  %835 = vadd.xlane.f32.xlu0 %v834_v32 }
 0x199   : >> { %844 = vadd.xlane.f32.xlu1 %v843_v19  ;;  %841 = vadd.xlane.f32.xlu0 %v840_v20 }
 0x19d   : >> { %850 = vadd.xlane.f32.xlu1 %v849_v27  ;;  %847 = vadd.xlane.f32.xlu0 %v846_v33 }
 0x1a1   : >> { %856 = vadd.xlane.f32.xlu1 %v855_v44  ;;  %853 = vadd.xlane.f32.xlu0 %v852_v45 }
 0x1a5   : >> { %862 = vadd.xlane.f32.xlu1 %v861_v50  ;;  %859 = vadd.xlane.f32.xlu0 %v858_v51 }
 0x1a9   : >> { %868 = vadd.xlane.f32.xlu1 %v867_v53  ;;  %865 = vadd.xlane.f32.xlu0 %v864_v54 }
 0x1ad   : >> { %874 = vadd.xlane.f32.xlu1 %v873_v57  ;;  %871 = vadd.xlane.f32.xlu0 %v870_v58 }
 0x1be   : >> { %v2608_v59 = vpop.xlane.xlu1 %691  ;;  %v2610_v60 = vpop.xlane.xlu0 %685  ;;  %886 = vbcast.lane.b32.xlu1 %v3151_v9, 264 }
 0x1c2   : >> { %v2613_v61 = vpop.xlane.xlu1 %694  ;;  %v2615_v62 = vpop.xlane.xlu0 %688  ;;  %890 = vbcast.lane.b32.xlu1 %v3151_v9, 272 }
 0x1c3   : >> { %882 = vbcast.lane.b32.xlu0 %v3151_v9, 256 }
 0x1c6   : >> { %v2619_v63 = vpop.xlane.xlu1 %700  ;;  %v2621_v10 = vpop.xlane.xlu0 %697  ;;  %894 = vbcast.lane.b32.xlu1 %v3151_v9, 280 }
 0x1c7   : >> { %898 = vbcast.lane.b32.xlu0 %v3151_v9, 288 }
 0x1ca   : >> { %v2625_v11 = vpop.xlane.xlu1 %706  ;;  %v2627_v12 = vpop.xlane.xlu0 %703  ;;  %902 = vbcast.lane.b32.xlu1 %v3151_v9, 296 }
 0x1cb   : >> { %906 = vbcast.lane.b32.xlu0 %v3151_v9, 304 }
 0x1ce   : >> { %v2631_v13 = vpop.xlane.xlu1 %712  ;;  %v2633_v14 = vpop.xlane.xlu0 %709  ;;  %910 = vbcast.lane.b32.xlu1 %v3151_v9, 312 }
 0x1d2   : >> { %v2636_v15 = vpop.xlane.xlu1 %718  ;;  %v2638_v16 = vpop.xlane.xlu0 %715 }
 0x1d6   : >> { %v2640_v32 = vpop.xlane.xlu1 %724  ;;  %v2642_v17 = vpop.xlane.xlu0 %721 }
 0x1da   : >> { %v2644_v18 = vpop.xlane.xlu1 %730  ;;  %v2646_v19 = vpop.xlane.xlu0 %727 }
 0x1de   : >> { %v2648_v20 = vpop.xlane.xlu1 %736  ;;  %v2650_v22 = vpop.xlane.xlu0 %733 }
 0x1e2   : >> { %v2652_v23 = vpop.xlane.xlu1 %742  ;;  %v2654_v26 = vpop.xlane.xlu0 %739 }
 0x1e6   : >> { %v2656_v28 = vpop.xlane.xlu1 %748  ;;  %v2658_v37 = vpop.xlane.xlu0 %745 }
 0x1ea   : >> { %v2660_v29 = vpop.xlane.xlu1 %754  ;;  %v2662_v27 = vpop.xlane.xlu0 %751 }
 0x1ee   : >> { %v2664_v33 = vpop.xlane.xlu1 %760  ;;  %v2666_v35 = vpop.xlane.xlu0 %757 }
 0x1f2   : >> { %v2668_v31 = vpop.xlane.xlu1 %766  ;;  %v2670_v30 = vpop.xlane.xlu0 %763 }
 0x1f6   : >> { %v2672_v38 = vpop.xlane.xlu1 %772  ;;  %v2674_v39 = vpop.xlane.xlu0 %769 }
 0x1fa   : >> { %v2676_v40 = vpop.xlane.xlu1 %778  ;;  %v2678_v41 = vpop.xlane.xlu0 %775 }
 0x1fe   : >> { %v2680_v42 = vpop.xlane.xlu1 %784  ;;  %v2682_v43 = vpop.xlane.xlu0 %781 }
 0x202   : >> { %v2684_v34 = vpop.xlane.xlu1 %790  ;;  %v2686_v44 = vpop.xlane.xlu0 %787 }
 0x206   : >> { %v2688_v45 = vpop.xlane.xlu1 %796  ;;  %v794_v46 = vpop.xlane.xlu0 %793 }
 0x207   : >> { %3162 = vst [vmem:[#allocation21_spill] sm:$0xff] %v2688_v45 }
 0x20a   : >> { %v2690_v47 = vpop.xlane.xlu1 %802  ;;  %v2692_v48 = vpop.xlane.xlu0 %799 }
 0x20b   : >> { %3163 = vst [vmem:[#allocation22_spill] sm:$0xff] %v2690_v47  ;;  %3164 = vst [vmem:[#allocation23_spill] sm:$0xff] %v2692_v48 }
 0x20e   : >> { %v809_v49 = vpop.xlane.xlu1 %808  ;;  %v806_v50 = vpop.xlane.xlu0 %805 }
 0x212   : >> { %v815_v51 = vpop.xlane.xlu1 %814  ;;  %v812_v52 = vpop.xlane.xlu0 %811 }
 0x216   : >> { %v821_v25 = vpop.xlane.xlu1 %820  ;;  %v818_v53 = vpop.xlane.xlu0 %817 }
 0x21a   : >> { %v2694_v54 = vpop.xlane.xlu1 %826  ;;  %v2696_v55 = vpop.xlane.xlu0 %823 }
 0x21b   : >> { %3165 = vst [vmem:[#allocation24_spill] sm:$0xff] %v2694_v54  ;;  %3166 = vst [vmem:[#allocation25_spill] sm:$0xff] %v2696_v55 }
 0x21e   : >> { %v833_v56 = vpop.xlane.xlu1 %832  ;;  %v830_v57 = vpop.xlane.xlu0 %829 }
 0x222   : >> { %v839_v58 = vpop.xlane.xlu1 %838  ;;  %v836_v36 = vpop.xlane.xlu0 %835 }
 0x226   : >> { %v845_v21 = vpop.xlane.xlu1 %844  ;;  %v842_v0 = vpop.xlane.xlu0 %841 }
 0x22a   : >> { %v2698_v1 = vpop.xlane.xlu1 %850  ;;  %v2700_v2 = vpop.xlane.xlu0 %847 }
 0x22b   : >> { %3167 = vst [vmem:[#allocation26_spill] sm:$0xff] %v2698_v1  ;;  %3168 = vst [vmem:[#allocation27_spill] sm:$0xff] %v2700_v2 }
 0x22e   : >> { %v857_v3 = vpop.xlane.xlu1 %856  ;;  %v854_v4 = vpop.xlane.xlu0 %853 }
 0x232   : >> { %v863_v5 = vpop.xlane.xlu1 %862  ;;  %v860_v6 = vpop.xlane.xlu0 %859 }
 0x236   : >> { %v869_v7 = vpop.xlane.xlu1 %868  ;;  %v866_v8 = vpop.xlane.xlu0 %865 }
 0x23a   : >> { %v2702_v9 = vpop.xlane.xlu1 %874  ;;  %v2704_v24 = vpop.xlane.xlu0 %871 }
 0x23b   : >> { %3169 = vst [vmem:[#allocation28_spill] sm:$0xff] %v2702_v9  ;;  %3170 = vst [vmem:[#allocation29_spill] sm:$0xff] %v2704_v24 }
 0x23e   : >> { %v2706_v54 = vpop.permute.xlu1 %886  ;;  %v2708_v55 = vpop.permute.xlu0 %882 }
 0x23f   : >> { %v921_v47 = vadd.f32 %v2706_v54, %v2615_v62  ;;  %v920_v1 = vadd.f32 %v2708_v55, %v2610_v60  ;;  %v2715_v2 = vadd.f32 %v2708_v55, %v806_v50  ;;  %v2722_v24 = vadd.f32 %v2706_v54, %v809_v49 }
 0x240   : >> { %v2725_v45 = vadd.f32 %v2708_v55, %v830_v57  ;;  %v2728_v62 = vadd.f32 %v2706_v54, %v833_v56  ;;  %v2731_v60 = vadd.f32 %v2708_v55, %v854_v4  ;;  %v2750_v4 = vadd.f32 %v2706_v54, %v857_v3 }
 0x241   : >> { %1052 = vperm.xlu1 %2000, %v921_v47   ;;  %1049 = vperm.xlu0 %1999, %v920_v1  }
 0x242   : >> { %v2717_v48 = vpop.permute.xlu1 %890  ;;  %v2719_v9 = vpop.permute.xlu0 %898 }
 0x243   : >> { %v922_v1 = vadd.f32 %v2717_v48, %v2608_v59  ;;  %v2736_v47 = vadd.f32 %v2719_v9, %v794_v46  ;;  %v2739_v50 = vadd.f32 %v2717_v48, %v812_v52  ;;  %v2742_v49 = vadd.f32 %v2719_v9, %v818_v53 }
 0x244   : >> { %v2747_v56 = vadd.f32 %v2717_v48, %v836_v36  ;;  %v2753_v59 = vadd.f32 %v2717_v48, %v860_v6  ;;  %v2756_v46 = vadd.f32 %v2719_v9, %v842_v0  ;;  %v924_v53 = vadd.f32 %v2719_v9, %v2621_v10 }
 0x245   : >> { %1055 = vperm.xlu1 %2000, %v922_v1  }
 0x246   : >> { %v2744_v57 = vpop.permute.xlu1 %894  ;;  %v2762_v1 = vpop.permute.xlu0 %906 }
 0x247   : >> { %v923_v52 = vadd.f32 %v2744_v57, %v2613_v61  ;;  %v2765_v36 = vadd.f32 %v2744_v57, %v815_v51  ;;  %v2770_v6 = vadd.f32 %v2744_v57, %v839_v58  ;;  %v2773_v0 = vadd.f32 %v2744_v57, %v863_v5 }
 0x248   : >> { %v2776_v61 = vadd.f32 %v2719_v9, %v866_v8 }
 0x249   : >> { %1058 = vperm.xlu0 %1999, %v923_v52   ;;  %1061 = vperm.xlu1 %2000, %v924_v53   ;;  %v926_v52 = vadd.f32 %v2762_v1, %v2627_v12  ;;  %v929_v12 = vadd.f32 %v2706_v54, %v2631_v13 }
 0x24a   : >> { %v2767_v3 = vpop.permute.xlu1 %902 }
 0x24b   : >> { %v925_v10 = vadd.f32 %v2767_v3, %v2619_v63  ;;  %v2783_v51 = vadd.f32 %v2767_v3, %v821_v25  ;;  %v2786_v53 = vadd.f32 %v2767_v3, %v845_v21  ;;  %v2789_v5 = vadd.f32 %v2767_v3, %v869_v7 }
 0x24c   : >> { %v928_v63 = vadd.f32 %v2708_v55, %v2633_v14  ;;  %v930_v21 = vadd.f32 %v2717_v48, %v2638_v16  ;;  %v931_v7 = vadd.f32 %v2744_v57, %v2636_v15  ;;  %v932_v25 = vadd.f32 %v2719_v9, %v2642_v17 }
 0x24d   : >> { %1064 = vperm.xlu0 %1999, %v925_v10   ;;  %1067 = vperm.xlu1 %2000, %v926_v52   ;;  %v934_v14 = vadd.f32 %v2762_v1, %v2646_v19  ;;  %v936_v16 = vadd.f32 %v2708_v55, %v2650_v22  ;;  %v937_v15 = vadd.f32 %v2706_v54, %v2648_v20 }
 0x24e   : >> { %v2791_v58 = vpop.permute.xlu1 %910  ;;  %v938_v17 = vadd.f32 %v2717_v48, %v2654_v26  ;;  %v940_v19 = vadd.f32 %v2719_v9, %v2658_v37  ;;  %v942_v22 = vadd.f32 %v2762_v1, %v2662_v27  ;;  %v944_v26 = vadd.f32 %v2708_v55, %v2666_v35 }
 0x24f   : >> { %v927_v8 = vadd.f32 %v2791_v58, %v2625_v11  ;;  %v933_v11 = vadd.f32 %v2767_v3, %v2640_v32  ;;  %v935_v13 = vadd.f32 %v2791_v58, %v2644_v18  ;;  %v939_v32 = vadd.f32 %v2744_v57, %v2652_v23 }
 0x250   : >> { %v941_v18 = vadd.f32 %v2767_v3, %v2656_v28  ;;  %v943_v20 = vadd.f32 %v2791_v58, %v2660_v29  ;;  %v945_v23 = vadd.f32 %v2706_v54, %v2664_v33  ;;  %v946_v37 = vadd.f32 %v2717_v48, %v2670_v30 }
 0x251   : >> { %1070 = vperm.xlu0 %1999, %v927_v8   ;;  %1073 = vperm.xlu1 %2000, %v928_v63   ;;  %v947_v28 = vadd.f32 %v2744_v57, %v2668_v31  ;;  %v948_v27 = vadd.f32 %v2719_v9, %v2674_v39  ;;  %v949_v29 = vadd.f32 %v2767_v3, %v2672_v38  ;;  %v3171_v39 = vld [vmem:[#allocation21_spill] sm:$0xff] }
 0x252   : >> { %v950_v35 = vadd.f32 %v2762_v1, %v2678_v41  ;;  %v951_v33 = vadd.f32 %v2791_v58, %v2676_v40  ;;  %v952_v30 = vadd.f32 %v2708_v55, %v2682_v43  ;;  %v953_v9 = vadd.f32 %v2706_v54, %v2680_v42  ;;  %v3172_v41 = vld [vmem:[#allocation23_spill] sm:$0xff]  ;;  %v3173_v42 = vld [vmem:[#allocation22_spill] sm:$0xff] }
 0x253   : >> { %v954_v31 = vadd.f32 %v2717_v48, %v2686_v44  ;;  %v955_v38 = vadd.f32 %v2744_v57, %v2684_v34  ;;  %v957_v40 = vadd.f32 %v2767_v3, %v3171_v39  ;;  %v958_v43 = vadd.f32 %v2762_v1, %v3172_v41  ;;  %v3175_v34 = vld [vmem:[#allocation24_spill] sm:$0xff]  ;;  %v3177_v55 = vld [vmem:[#allocation27_spill] sm:$0xff] }
 0x254   : >> { %v959_v54 = vadd.f32 %v2791_v58, %v3173_v42  ;;  %v967_v44 = vadd.f32 %v2791_v58, %v3175_v34 }
 0x255   : >> { %1076 = vperm.xlu0 %1999, %v929_v12   ;;  %1079 = vperm.xlu1 %2000, %v930_v21  }
 0x259   : >> { %1082 = vperm.xlu0 %1999, %v931_v7   ;;  %1085 = vperm.xlu1 %2000, %v932_v25  }
 0x25d   : >> { %1088 = vperm.xlu0 %1999, %v933_v11   ;;  %1091 = vperm.xlu1 %2000, %v934_v14  }
 0x261   : >> { %1094 = vperm.xlu0 %1999, %v935_v13   ;;  %1097 = vperm.xlu1 %2000, %v936_v16  }
 0x265   : >> { %1100 = vperm.xlu0 %1999, %v937_v15   ;;  %1103 = vperm.xlu1 %2000, %v938_v17  }
 0x269   : >> { %1106 = vperm.xlu0 %1999, %v939_v32   ;;  %1109 = vperm.xlu1 %2000, %v940_v19  }
 0x26d   : >> { %1112 = vperm.xlu0 %1999, %v941_v18   ;;  %1115 = vperm.xlu1 %2000, %v942_v22  }
 0x271   : >> { %1118 = vperm.xlu0 %1999, %v943_v20   ;;  %1121 = vperm.xlu1 %2000, %v944_v26  }
 0x275   : >> { %1124 = vperm.xlu0 %1999, %v945_v23   ;;  %1127 = vperm.xlu1 %2000, %v946_v37  }
 0x279   : >> { %1130 = vperm.xlu0 %1999, %v947_v28   ;;  %1133 = vperm.xlu1 %2000, %v948_v27  }
 0x27d   : >> { %1136 = vperm.xlu0 %1999, %v949_v29   ;;  %1139 = vperm.xlu1 %2000, %v950_v35  }
 0x281   : >> { %1142 = vperm.xlu0 %1999, %v951_v33   ;;  %1145 = vperm.xlu1 %2000, %v952_v30  }
 0x285   : >> { %1148 = vperm.xlu0 %1999, %v953_v9   ;;  %1151 = vperm.xlu1 %2000, %v954_v31  }
 0x289   : >> { %1154 = vperm.xlu0 %1999, %v955_v38   ;;  %1157 = vperm.xlu1 %2000, %v2736_v47   ;;  %v3178_v47 = vld [vmem:[#allocation26_spill] sm:$0xff] }
 0x28d   : >> { %1160 = vperm.xlu0 %1999, %v957_v40   ;;  %1163 = vperm.xlu1 %2000, %v958_v43  }
 0x291   : >> { %1166 = vperm.xlu0 %1999, %v959_v54   ;;  %1169 = vperm.xlu1 %2000, %v2715_v2   ;;  %v3174_v2 = vld [vmem:[#allocation25_spill] sm:$0xff] }
 0x295   : >> { %1172 = vperm.xlu0 %1999, %v2722_v24   ;;  %1175 = vperm.xlu1 %2000, %v2739_v50   ;;  %v966_v24 = vadd.f32 %v2762_v1, %v3174_v2  ;;  %v975_v50 = vadd.f32 %v2791_v58, %v3178_v47 }
 0x299   : >> { %1178 = vperm.xlu0 %1999, %v2765_v36   ;;  %1181 = vperm.xlu1 %2000, %v2742_v49   ;;  %v3179_v49 = vld [vmem:[#allocation29_spill] sm:$0xff]  ;;  %v3181_v36 = vld [vmem:[#allocation28_spill] sm:$0xff] }
 0x29a   : >> { %v982_v57 = vadd.f32 %v2762_v1, %v3179_v49  ;;  %v983_v3 = vadd.f32 %v2791_v58, %v3181_v36 }
 0x29d   : >> { %1193 = vperm.xlu0 %1999, %v2725_v45   ;;  %1196 = vperm.xlu1 %2000, %v2728_v62   ;;  %v3176_v45 = vlaneseq  ;;  %v974_v62 = vadd.f32 %v2762_v1, %v3177_v55 }
 0x29f   : >> { %v1241_v48 = vand.u32 127, %v3176_v45 }
 0x2a1   : >> { %1199 = vperm.xlu0 %1999, %v2747_v56   ;;  %1217 = vperm.xlu1 %2000, %v2731_v60   ;;  %v1246_v60 = vadd.s32 4294967288, %v1241_v48  ;;  %v3180_v56 = vld [vmem:[#allocation20_spill] sm:$0xff]  ;;  %v1281_v12 = vadd.s32 4294967248, %v1241_v48  ;;  %v1274_v21 = vadd.s32 4294967256, %v1241_v48  ;;  %v1288_v14 = vadd.s32 4294967240, %v1241_v48 }
 0x2a3   : >> { %v2912_v15 = vsub.s32 %v1281_v12, %v3180_v56  ;;  %v2915_v17 = vsub.s32 %v1274_v21, %v3180_v56  ;;  %v2922_v23 = vsub.s32 %v1288_v14, %v3180_v56 }
 0x2a5   : >> { %1220 = vperm.xlu0 %1999, %v2750_v4   ;;  %1202 = vperm.xlu1 %2000, %v2770_v6   ;;  %v2888_v4 = vsub.s32 %v1246_v60, %v3180_v56 }
 0x2a9   : >> { %1223 = vperm.xlu0 %1999, %v2753_v59   ;;  %1184 = vperm.xlu1 %2000, %v2783_v51   ;;  %v2891_v59 = vsub.s32 %v1241_v48, %v3180_v56  ;;  %v1260_v51 = vadd.s32 4294967272, %v1241_v48 }
 0x2ab   : >> { %v2906_v63 = vsub.s32 %v1260_v51, %v3180_v56 }
 0x2ad   : >> { %1205 = vperm.xlu0 %1999, %v2756_v46   ;;  %1226 = vperm.xlu1 %2000, %v2773_v0   ;;  %v1253_v46 = vadd.s32 4294967280, %v1241_v48 }
 0x2af   : >> { %v2898_v52 = vsub.s32 %v1253_v46, %v3180_v56 }
 0x2b1   : >> { %1187 = vperm.xlu0 %1999, %v966_v24   ;;  %1208 = vperm.xlu1 %2000, %v2786_v53  }
 0x2b5   : >> { %1229 = vperm.xlu0 %1999, %v2776_v61   ;;  %1190 = vperm.xlu1 %2000, %v967_v44   ;;  %v1267_v61 = vadd.s32 4294967264, %v1241_v48 }
 0x2b7   : >> { %v2902_v8 = vsub.s32 %v1267_v61, %v3180_v56 }
 0x2b9   : >> { %1211 = vperm.xlu0 %1999, %v974_v62   ;;  %1232 = vperm.xlu1 %2000, %v2789_v5  }
 0x2bd   : >> { %1214 = vperm.xlu0 %1999, %v975_v50   ;;  %1235 = vperm.xlu1 %2000, %v982_v57  }
 0x2c0   : >> { %v1053_v6 = vpop.permute.xlu1 %1052  ;;  %v1050_v0 = vpop.permute.xlu0 %1049 }
 0x2c1   : >> { %v1250_v10 = vrot.slane %v1053_v6, %v2888_v4  ;;  %v1245_v1 = vrot.slane %v1050_v0, %v2891_v59  ;;  %1238 = vperm.xlu0 %1999, %v983_v3  }
 0x2c3   : >> { %v1252_v53 = vsel %vm1251_vm2, %v1250_v10, %v1245_v1 }
 0x2c4   : >> { %v1056_v5 = vpop.permute.xlu1 %1055 }
 0x2c5   : >> { %v1257_v58 = vrot.slane %v1056_v5, %v2898_v52 }
 0x2c7   : >> { %v1259_v7 = vsel %vm1258_vm3, %v1257_v58, %v1252_v53 }
 0x2c8   : >> { %v1062_v25 = vpop.permute.xlu1 %1061  ;;  %v1059_v11 = vpop.permute.xlu0 %1058 }
 0x2c9   : >> { %v1271_v13 = vrot.slane %v1062_v25, %v2902_v8  ;;  %v1264_v16 = vrot.slane %v1059_v11, %v2906_v63 }
 0x2cb   : >> { %v1266_v32 = vsel %vm1265_vm4, %v1264_v16, %v1259_v7 }
 0x2cc   : >> { %v1068_v19 = vpop.permute.xlu1 %1067  ;;  %v1273_v18 = vsel %vm1272_vm5, %v1271_v13, %v1266_v32  ;;  %v1065_v22 = vpop.permute.xlu0 %1064 }
 0x2cd   : >> { %v1285_v20 = vrot.slane %v1068_v19, %v2912_v15  ;;  %v1278_v26 = vrot.slane %v1065_v22, %v2915_v17 }
 0x2cf   : >> { %v1280_v37 = vsel %vm1279_vm6, %v1278_v26, %v1273_v18 }
 0x2d0   : >> { %v1074_v28 = vpop.permute.xlu1 %1073  ;;  %v1287_v27 = vsel %vm1286_vm7, %v1285_v20, %v1280_v37  ;;  %v1071_v29 = vpop.permute.xlu0 %1070 }
 0x2d1   : >> { %v1292_v35 = vrot.slane %v1071_v29, %v2922_v23  ;;  %v1298_v31 = vrot.slane %v1074_v28, %v2891_v59 }
 0x2d3   : >> { %v1294_v33 = vsel %vm1293_vm8, %v1292_v35, %v1287_v27 }
 0x2d4   : >> { %v1080_v30 = vpop.permute.xlu1 %1079  ;;  %v1077_v9 = vpop.permute.xlu0 %1076 }
 0x2d5   : >> { %v1307_v38 = vrot.slane %v1080_v30, %v2898_v52  ;;  %v1302_v39 = vrot.slane %v1077_v9, %v2888_v4 }
 0x2d7   : >> { %v1303_v40 = vsel %vm1251_vm2, %v1302_v39, %v1298_v31 }
 0x2d8   : >> { %v1086_v41 = vpop.permute.xlu1 %1085  ;;  %v1308_v43 = vsel %vm1258_vm3, %v1307_v38, %v1303_v40  ;;  %v1083_v42 = vpop.permute.xlu0 %1082 }
 0x2d9   : >> { %v1317_v54 = vrot.slane %v1086_v41, %v2902_v8  ;;  %v1312_v2 = vrot.slane %v1083_v42, %v2906_v63 }
 0x2db   : >> { %v1313_v24 = vsel %vm1265_vm4, %v1312_v2, %v1308_v43 }
 0x2dc   : >> { %v1092_v34 = vpop.permute.xlu1 %1091  ;;  %v1318_v44 = vsel %vm1272_vm5, %v1317_v54, %v1313_v24  ;;  %v1089_v45 = vpop.permute.xlu0 %1088 }
 0x2dd   : >> { %v1327_v48 = vrot.slane %v1092_v34, %v2912_v15  ;;  %v1322_v55 = vrot.slane %v1089_v45, %v2915_v17 }
 0x2df   : >> { %v1323_v62 = vsel %vm1279_vm6, %v1322_v55, %v1318_v44 }
 0x2e0   : >> { %v1098_v60 = vpop.permute.xlu1 %1097  ;;  %v1328_v47 = vsel %vm1286_vm7, %v1327_v48, %v1323_v62  ;;  %v1095_v50 = vpop.permute.xlu0 %1094 }
 0x2e1   : >> { %v1332_v49 = vrot.slane %v1095_v50, %v2922_v23  ;;  %v1337_v3 = vrot.slane %v1098_v60, %v2891_v59 }
 0x2e3   : >> { %v1333_v57 = vsel %vm1293_vm8, %v1332_v49, %v1328_v47 }
 0x2e4   : >> { %v1569_v56 = vsel %vm1568_vm9, %v1333_v57, %v1294_v33  ;;  %v1104_v46 = vpop.permute.xlu1 %1103  ;;  %v1101_v36 = vpop.permute.xlu0 %1100 }
 0x2e5   : >> { %v1346_v6 = vrot.slane %v1104_v46, %v2898_v52  ;;  %v1341_v0 = vrot.slane %v1101_v36, %v2888_v4 }
 0x2e7   : >> { %v1342_v61 = vsel %vm1251_vm2, %v1341_v0, %v1337_v3 }
 0x2e8   : >> { %v1110_v10 = vpop.permute.xlu1 %1109  ;;  %v1347_v1 = vsel %vm1258_vm3, %v1346_v6, %v1342_v61  ;;  %v1107_v51 = vpop.permute.xlu0 %1106 }
 0x2e9   : >> { %v1356_v53 = vrot.slane %v1110_v10, %v2902_v8  ;;  %v1351_v5 = vrot.slane %v1107_v51, %v2906_v63 }
 0x2eb   : >> { %v1352_v58 = vsel %vm1265_vm4, %v1351_v5, %v1347_v1 }
 0x2ec   : >> { %v1116_v12 = vpop.permute.xlu1 %1115  ;;  %v1357_v21 = vsel %vm1272_vm5, %v1356_v53, %v1352_v58  ;;  %v1113_v7 = vpop.permute.xlu0 %1112 }
 0x2ed   : >> { %v1366_v25 = vrot.slane %v1116_v12, %v2912_v15  ;;  %v1361_v11 = vrot.slane %v1113_v7, %v2915_v17 }
 0x2ef   : >> { %v1362_v14 = vsel %vm1279_vm6, %v1361_v11, %v1357_v21 }
 0x2f0   : >> { %v1122_v13 = vpop.permute.xlu1 %1121  ;;  %v1367_v16 = vsel %vm1286_vm7, %v1366_v25, %v1362_v14  ;;  %v1119_v32 = vpop.permute.xlu0 %1118 }
 0x2f1   : >> { %v1371_v19 = vrot.slane %v1119_v32, %v2922_v23  ;;  %v1376_v37 = vrot.slane %v1122_v13, %v2891_v59 }
 0x2f3   : >> { %v1372_v18 = vsel %vm1293_vm8, %v1371_v19, %v1367_v16 }
 0x2f4   : >> { %v1571_v22 = vsel %vm1570_vm10, %v1372_v18, %v1569_v56  ;;  %v1128_v20 = vpop.permute.xlu1 %1127  ;;  %v1125_v26 = vpop.permute.xlu0 %1124 }
 0x2f5   : >> { %v1385_v28 = vrot.slane %v1128_v20, %v2898_v52  ;;  %v1380_v27 = vrot.slane %v1125_v26, %v2888_v4 }
 0x2f7   : >> { %v1381_v29 = vsel %vm1251_vm2, %v1380_v27, %v1376_v37 }
 0x2f8   : >> { %v1134_v35 = vpop.permute.xlu1 %1133  ;;  %v1386_v33 = vsel %vm1258_vm3, %v1385_v28, %v1381_v29  ;;  %v1131_v30 = vpop.permute.xlu0 %1130 }
 0x2f9   : >> { %v1390_v9 = vrot.slane %v1131_v30, %v2906_v63  ;;  %v1395_v31 = vrot.slane %v1134_v35, %v2902_v8 }
 0x2fb   : >> { %v1391_v38 = vsel %vm1265_vm4, %v1390_v9, %v1386_v33 }
 0x2fc   : >> { %v1140_v39 = vpop.permute.xlu1 %1139  ;;  %v1137_v40 = vpop.permute.xlu0 %1136  ;;  %v1396_v42 = vsel %vm1272_vm5, %v1395_v31, %v1391_v38 }
 0x2fd   : >> { %v1400_v41 = vrot.slane %v1137_v40, %v2915_v17  ;;  %v1405_v43 = vrot.slane %v1140_v39, %v2912_v15 }
 0x2ff   : >> { %v1401_v54 = vsel %vm1279_vm6, %v1400_v41, %v1396_v42 }
 0x300   : >> { %v1146_v2 = vpop.permute.xlu1 %1145  ;;  %v1143_v24 = vpop.permute.xlu0 %1142  ;;  %v1406_v44 = vsel %vm1286_vm7, %v1405_v43, %v1401_v54 }
 0x301   : >> { %v1410_v34 = vrot.slane %v1143_v24, %v2922_v23  ;;  %v1415_v21 = vrot.slane %v1146_v2, %v2891_v59 }
 0x303   : >> { %v1411_v45 = vsel %vm1293_vm8, %v1410_v34, %v1406_v44 }
 0x304   : >> { %v2973_v48 = vsel %vm1572_vm11, %v1411_v45, %v1571_v22  ;;  %v1152_v55 = vpop.permute.xlu1 %1151  ;;  %v1149_v62 = vpop.permute.xlu0 %1148 }
 0x305   : >> { %v1419_v5 = vrot.slane %v1149_v62, %v2888_v4  ;;  %v1424_v7 = vrot.slane %v1152_v55, %v2898_v52 }
 0x307   : >> { %v1420_v25 = vsel %vm1251_vm2, %v1419_v5, %v1415_v21 }
 0x308   : >> { %v1158_v60 = vpop.permute.xlu1 %1157  ;;  %v1155_v47 = vpop.permute.xlu0 %1154  ;;  %v1425_v32 = vsel %vm1258_vm3, %v1424_v7, %v1420_v25 }
 0x309   : >> { %v1429_v11 = vrot.slane %v1155_v47, %v2906_v63  ;;  %v1434_v16 = vrot.slane %v1158_v60, %v2902_v8 }
 0x30b   : >> { %v1430_v19 = vsel %vm1265_vm4, %v1429_v11, %v1425_v32 }
 0x30c   : >> { %v1164_v50 = vpop.permute.xlu1 %1163  ;;  %v1161_v49 = vpop.permute.xlu0 %1160  ;;  %v1435_v28 = vsel %vm1272_vm5, %v1434_v16, %v1430_v19 }
 0x30d   : >> { %v1439_v18 = vrot.slane %v1161_v49, %v2915_v17  ;;  %v1444_v37 = vrot.slane %v1164_v50, %v2912_v15 }
 0x30f   : >> { %v1440_v27 = vsel %vm1279_vm6, %v1439_v18, %v1435_v28 }
 0x310   : >> { %v1170_v57 = vpop.permute.xlu1 %1169  ;;  %v1167_v56 = vpop.permute.xlu0 %1166  ;;  %v1445_v41 = vsel %vm1286_vm7, %v1444_v37, %v1440_v27 }
 0x311   : >> { %v1454_v29 = vrot.slane %v1170_v57, %v2891_v59  ;;  %v1449_v35 = vrot.slane %v1167_v56, %v2922_v23 }
 0x313   : >> { %v1450_v43 = vsel %vm1293_vm8, %v1449_v35, %v1445_v41 }
 0x314   : >> { %v1176_v46 = vpop.permute.xlu1 %1175  ;;  %v1173_v36 = vpop.permute.xlu0 %1172 }
 0x315   : >> { %v1458_v26 = vrot.slane %v1173_v36, %v2888_v4  ;;  %v1463_v33 = vrot.slane %v1176_v46, %v2898_v52 }
 0x317   : >> { %v1459_v31 = vsel %vm1251_vm2, %v1458_v26, %v1454_v29 }
 0x318   : >> { %v1182_v3 = vpop.permute.xlu1 %1181  ;;  %v1179_v6 = vpop.permute.xlu0 %1178  ;;  %v1464_v2 = vsel %vm1258_vm3, %v1463_v33, %v1459_v31 }
 0x319   : >> { %v1468_v38 = vrot.slane %v1179_v6, %v2906_v63  ;;  %v1473_v54 = vrot.slane %v1182_v3, %v2902_v8 }
 0x31b   : >> { %v1469_v55 = vsel %vm1265_vm4, %v1468_v38, %v1464_v2 }
 0x31c   : >> { %v1197_v0 = vpop.permute.xlu1 %1196  ;;  %v1194_v61 = vpop.permute.xlu0 %1193 }
 0x31d   : >> { %v1497_v39 = vrot.slane %v1197_v0, %v2888_v4  ;;  %v1493_v40 = vrot.slane %v1194_v61, %v2891_v59 }
 0x31f   : >> { %v1498_v62 = vsel %vm1251_vm2, %v1497_v39, %v1493_v40 }
 0x320   : >> { %v1218_v10 = vpop.permute.xlu1 %1217  ;;  %v1200_v1 = vpop.permute.xlu0 %1199 }
 0x321   : >> { %v1502_v42 = vrot.slane %v1200_v1, %v2898_v52  ;;  %v1532_v50 = vrot.slane %v1218_v10, %v2891_v59  ;;  %v1474_v59 = vsel %vm1272_vm5, %v1473_v54, %v1469_v55 }
 0x324   : >> { %v1203_v51 = vpop.permute.xlu1 %1202  ;;  %v1221_v53 = vpop.permute.xlu0 %1220 }
 0x325   : >> { %v1507_v24 = vrot.slane %v1203_v51, %v2906_v63  ;;  %v1536_v34 = vrot.slane %v1221_v53, %v2888_v4  ;;  %v1503_v4 = vsel %vm1258_vm3, %v1502_v42, %v1498_v62 }
 0x327   : >> { %v1508_v6 = vsel %vm1265_vm4, %v1507_v24, %v1503_v4  ;;  %v1537_v0 = vsel %vm1251_vm2, %v1536_v34, %v1532_v50  ;;  %v1629_v50 = vld [vmem:[#allocation4] sm:$0xff] (%p389_p6)  ;;  %v1632_v4 = vld [vmem:[#allocation4 + $0x18] sm:$0xff] (%p389_p6) }
 0x328   : >> { %v1185_v58 = vpop.permute.xlu1 %1184  ;;  %v1224_v12 = vpop.permute.xlu0 %1223 }
 0x329   : >> { %v1478_v60 = vrot.slane %v1185_v58, %v2915_v17  ;;  %v1541_v49 = vrot.slane %v1224_v12, %v2898_v52 }
 0x32b   : >> { %v1479_v1 = vsel %vm1279_vm6, %v1478_v60, %v1474_v59  ;;  %v1542_v5 = vsel %vm1258_vm3, %v1541_v49, %v1537_v0  ;;  %v1630_v49 = vld [vmem:[#allocation4 + $0x8] sm:$0xff] (%p389_p6)  ;;  %v1635_v0 = vld [vmem:[#allocation4 + $0x30] sm:$0xff] (%p389_p6)  ;;  %v1636_v59 = vld [vmem:[#allocation4 + $0x38] sm:$0xff] (%p389_p6) }
 0x32c   : >> { %v1227_v14 = vpop.permute.xlu1 %1226  ;;  %v1206_v13 = vpop.permute.xlu0 %1205 }
 0x32d   : >> { %v1512_v47 = vrot.slane %v1206_v13, %v2902_v8  ;;  %v1546_v46 = vrot.slane %v1227_v14, %v2906_v63  ;;  %v1575_v13 = vsel %vm1574_vm12, %v1450_v43, %v2973_v48 }
 0x32f   : >> { %v1513_v51 = vsel %vm1272_vm5, %v1512_v47, %v1508_v6 }
 0x330   : >> { %v1209_v22 = vpop.permute.xlu1 %1208  ;;  %v1188_v20 = vpop.permute.xlu0 %1187 }
 0x331   : >> { %v1517_v57 = vrot.slane %v1209_v22, %v2915_v17  ;;  %v1483_v56 = vrot.slane %v1188_v20, %v2912_v15 }
 0x333   : >> { %v1518_v58 = vsel %vm1279_vm6, %v1517_v57, %v1513_v51  ;;  %v1484_v12 = vsel %vm1286_vm7, %v1483_v56, %v1479_v1  ;;  %v1919_v57 = vpack.c.bf16 (%p389_p6), %v1630_v49, %v1629_v50  ;;  %v1631_v56 = vld [vmem:[#allocation4 + $0x10] sm:$0xff] (%p389_p6) }
 0x334   : >> { %v1191_v30 = vpop.permute.xlu1 %1190  ;;  %v1230_v9 = vpop.permute.xlu0 %1229 }
 0x335   : >> { %v1488_v36 = vrot.slane %v1191_v30, %v2922_v23  ;;  %v1551_v52 = vrot.slane %v1230_v9, %v2902_v8  ;;  %v1547_v8 = vsel %vm1265_vm4, %v1546_v46, %v1542_v5  ;;  %1920 = vmatprep.subr.bf16.mxu1 (%p389_p6), %v1919_v57  ;;  %v1923_v46 = vpack.c.bf16 (%p389_p6), %v1632_v4, %v1631_v56 }
 0x336   : > { %1922 = vmatpush3.bf16.msra.mxu1 (%p389_p6), %v1919_v57 }
 0x337   : >> { %v1489_v7 = vsel %vm1293_vm8, %v1488_v36, %v1484_v12  ;;  %1924 = vmatprep.subr.bf16.mxu1 (%p389_p6), %v1923_v46  ;;  %v1633_v36 = vld [vmem:[#allocation4 + $0x20] sm:$0xff] (%p389_p6) }
 0x338   : >> { %v1233_v44 = vpop.permute.xlu1 %1232  ;;  %v1212_v45 = vpop.permute.xlu0 %1211  ;;  %v1577_v32 = vsel %vm1576_vm13, %v1489_v7, %v1575_v13 }
 0x339   : >> { %v1522_v3 = vrot.slane %v1212_v45, %v2912_v15  ;;  %v1556_v63 = vrot.slane %v1233_v44, %v2915_v17  ;;  %v1552_v17 = vsel %vm1272_vm5, %v1551_v52, %v1547_v8  ;;  %v1931_v52 = vpack.c.bf16 (%p389_p6), %v1636_v59, %v1635_v0 }
 0x33a   : > { %1926 = vmatpush3.bf16.msra.mxu1 (%p389_p6), %v1923_v46 }
 0x33b   : >> { %v1523_v25 = vsel %vm1286_vm7, %v1522_v3, %v1518_v58  ;;  %v1557_v16 = vsel %vm1279_vm6, %v1556_v63, %v1552_v17  ;;  %v1634_v3 = vld [vmem:[#allocation4 + $0x28] sm:$0xff] (%p389_p6) }
 0x33c   : >> { %v1236_v61 = vpop.permute.xlu1 %1235  ;;  %v1215_v10 = vpop.permute.xlu0 %1214  ;;  %v1927_v6 = vpack.c.bf16 (%p389_p6), %v1634_v3, %v1633_v36 }
 0x33d   : >> { %v1527_v53 = vrot.slane %v1215_v10, %v2922_v23  ;;  %v1561_v21 = vrot.slane %v1236_v61, %v2912_v15 }
 0x33e   : > { %1928 = vmatprep.subr.bf16.mxu1 (%p389_p6), %v1927_v6 }
 0x33f   : >> { %v1528_v11 = vsel %vm1293_vm8, %v1527_v53, %v1523_v25  ;;  %v1562_v19 = vsel %vm1286_vm7, %v1561_v21, %v1557_v16  ;;  %391 = sbr.rel (!%p389_p6) target bundleno = 285 (0x11d), region = 93  ;;  %1930 = vmatpush3.bf16.msra.mxu1 (%p389_p6), %v1927_v6 }
 0x340   : >> { %v1239_v14 = vpop.permute.xlu0 %1238  ;;  %v1579_v18 = vsel %vm1578_vm14, %v1528_v11, %v1577_v32  ;;  %1932 = vmatprep.subr.bf16.mxu1 (%p389_p6), %v1931_v52 }
 0x341   : >> { %v1566_v15 = vrot.slane %v1239_v14, %v2922_v23 }
 0x343   : >> { %v1567_v22 = vsel %vm1293_vm8, %v1566_v15, %v1562_v19  ;;  %1934 = vmatpush3.bf16.msra.mxu1 (%p389_p6), %v1931_v52 }
 0x344   : >> { %v1581_v20 = vsel %vm1580_vm15, %v1567_v22, %v1579_v18 }
 0x345   : >> { %1584 = vst.msk [vmem:[%s1583_s19] sm:$0xff] %vm372_vm1, %v1581_v20 }
 0x34c   : > { %v1585_v48 = vld [vmem:[#allocation3] sm:$0xff]  ;;  %v1587_v26 = vld [vmem:[#allocation3 + $0x10] sm:$0xff]  ;;  %v1586_v23 = vld [vmem:[#allocation3 + $0x8] sm:$0xff] }
 0x34d   : > { %v1589_v37 = vsel %vm372_vm1, %v1585_v48, -inf  ;;  %v1595_v28 = vsel %vm372_vm1, %v1587_v26, -inf  ;;  %v1588_v27 = vld [vmem:[#allocation3 + $0x18] sm:$0xff]  ;;  %v1592_v29 = vsel %vm372_vm1, %v1586_v23, -inf }
 0x34e   : > { %1590 = vmax.xlane.f32.xlu0 %v1589_v37  ;;  %1596 = vmax.xlane.f32.xlu1 %v1595_v28  ;;  %v1598_v35 = vsel %vm372_vm1, %v1588_v27, -inf }
 0x352   : > { %1593 = vmax.xlane.f32.xlu0 %v1592_v29  ;;  %1599 = vmax.xlane.f32.xlu1 %v1598_v35 }
 0x3db   : > { %v1591_v33 = vpop.xlane.xlu0 %1590  ;;  %v1597_v30 = vpop.xlane.xlu1 %1596 }
 0x3dc   : > { %v1601_v9 = vsub.f32 %v1585_v48, %v1591_v33  ;;  %v1603_v31 = vsub.f32 %v1587_v26, %v1597_v30 }
 0x3de   : > { %v1605_v38 = vmul.f32 1.442695, %v1601_v9  ;;  %v1609_v39 = vmul.f32 1.442695, %v1603_v31 }
 0x3df   : > { %v1594_v40 = vpop.xlane.xlu0 %1593  ;;  %v1600_v41 = vpop.xlane.xlu1 %1599 }
 0x3e0   : > { %2002 = vpow2.f32 %v1605_v38  ;;  %v1602_v43 = vsub.f32 %v1586_v23, %v1594_v40  ;;  %v1604_v42 = vsub.f32 %v1588_v27, %v1600_v41 }
 0x3e1   : > { %2004 = vpow2.f32 %v1609_v39 }
 0x3e2   : > { %v1607_v54 = vmul.f32 1.442695, %v1602_v43  ;;  %v1611_v2 = vmul.f32 1.442695, %v1604_v42 }
 0x3e4   : > { %2006 = vpow2.f32 %v1607_v54 }
 0x3e5   : > { %2008 = vpow2.f32 %v1611_v2 }
 0x3ea   : > { %v2003_v24 = vpop.eup %2002 }
 0x3eb   : > { %v2005_v34 = vpop.eup %2004  ;;  %v1613_v44 = vsel %vm372_vm1, %v2003_v24, 0.0 }
 0x3ec   : > { %1614 = vadd.xlane.f32.xlu0 %v1613_v44  ;;  %v1619_v45 = vsel %vm372_vm1, %v2005_v34, 0.0 }
 0x3ee   : > { %v2007_v55 = vpop.eup %2006 }
 0x3ef   : > { %v2009_v62 = vpop.eup %2008  ;;  %v1616_v60 = vsel %vm372_vm1, %v2007_v55, 0.0 }
 0x3f0   : > { %1620 = vadd.xlane.f32.xlu0 %v1619_v45  ;;  %1617 = vadd.xlane.f32.xlu1 %v1616_v60  ;;  %v1622_v47 = vsel %vm372_vm1, %v2009_v62, 0.0 }
 0x3f4   : > { %1623 = vadd.xlane.f32.xlu1 %v1622_v47 }
 0x479   : > { %v1615_v61 = vpop.xlane.xlu0 %1614 }
 0x47a   : > { %2010 = vrcp.f32 %v1615_v61 }
 0x47d   : > { %v1618_v10 = vpop.xlane.xlu1 %1617  ;;  %v1621_v1 = vpop.xlane.xlu0 %1620 }
 0x47e   : > { %2012 = vrcp.f32 %v1618_v10 }
 0x47f   : > { %2014 = vrcp.f32 %v1621_v1 }
 0x481   : > { %v1624_v51 = vpop.xlane.xlu1 %1623 }
 0x482   : > { %2016 = vrcp.f32 %v1624_v51 }
 0x484   : > { %v2011_v63 = vpop.eup %2010 }
 0x485   : > { %v1637_v53 = vmul.f32 %v2011_v63, %v2003_v24 }
 0x487   : > { %1909 = vmatprep.mubr.msk.f32.mxu1 %vm372_vm1, %v1637_v53 }
 0x488   : > { %v2013_v5 = vpop.eup %2012 }
 0x489   : > { %v2015_v58 = vpop.eup %2014  ;;  %v1638_v12 = vmul.f32 %v2013_v5, %v2007_v55 }
 0x48a   : > { %v1639_v21 = vmul.f32 %v2015_v58, %v2005_v34 }
 0x48b   : > { %1910 = vmatmul.mubr.msk.f32.vlgmr.msra.gmra.mrb[0].mxu1 %vm372_vm1, %v1638_v12 }
 0x48c   : > { %v2017_v8 = vpop.eup %2016  ;;  %1912 = vmatprep.mubr.msk.f32.mxu1 %vm372_vm1, %v1639_v21 }
 0x48d   : > { %v1640_v7 = vmul.f32 %v2017_v8, %v2009_v62 }
 0x48f   : > { %1913 = vmatmul.mubr.msk.f32.gmra.mrb[2].mxu1 %vm372_vm1, %v1640_v7 }
 0x55e   : > { %v1911_v25 = vpop.f32.mrb[0].mxu1 }
 0x55f   : > { %1739 = vst [vmem:[%s2318_s17 + $0x8] sm:$0xff] %v1911_v25  ;;  %v1719_v17 = vpop.f32.mrb[1].mxu1 }
 0x560   : > { %1738 = vst [vmem:[%s2318_s17] sm:$0xff] %v1719_v17 }
 0x562   : > { %v1914_v11 = vpop.f32.mrb[2].mxu1 }
 0x563   : > { %1741 = vst [vmem:[%s2318_s17 + $0x18] sm:$0xff] %v1914_v11  ;;  %v1729_v14 = vpop.f32.mrb[3].mxu1 }
 0x564   : > { %1740 = vst [vmem:[%s2318_s17 + $0x10] sm:$0xff] %v1729_v14 }
 0x565   : > { %2059 = shalt.err (!%p2056_p8)
}
 0x566   : > { %s2060_s13 = scalar_lea.hbm %s3062_s10, 512  ;;  %s2064_s16 = scalar_lea.hbm %s3117_s6, 1024 }
 0x567   : > { %p2061_p11 = scmp.ne.s32.totalorder %s3062_s10, %s2060_s13  ;;  %p2065_p0 = scmp.lt.u32.totalorder %s3062_s10, %s3117_s6 }
 0x568   : > { %p2066_p5 = scmp.lt.u32.totalorder %s2064_s16, %s2060_s13  ;;  %p2068_p9 = scmp.lt.u32.totalorder %s2060_s13, %s3062_s10 }
 0x569   : > { %p2062_p13 = pnand %p2061_p11, %p3182_p10 }
 0x56a   : > { %p2067_p6 = por %p2066_p5, %p2065_p0 }
 0x56b   : > { %p2063_p1 = pneg %p2062_p13 }
 0x56c   : > { %p2069_p12 = por %p2068_p9, %p2067_p6 }
 0x56e   : > { %p2070_p2 = pnand %p2069_p12, %p2063_p1 }
 0x570   : > { %2073 = shalt.err (!%p2070_p2)
}
 0x571   : > { %s2128_s20 = smov 128   ;;  %s2129_s28 = smov 8  }
 0x572   : > { %1939 = dma.vmem_to_hbm [thread:$0]  (%p3182_p10), %s3064_s26, 512, %s3062_s10, %s3070_s25, %s2128_s20, %s2128_s20, %s2129_s28  }
 0x573 PF: > { %p1951_p3 = scmp.ge.s32.totalorder %s2116_s24, 2  ;;  %s1771_s29 = sand.u32 1, %s2104_s21  }
 0x574   : > { %p3183_p4 = scmp.ne.s32.totalorder %s3135_s8, 0  ;;  %s1772_s11 = scalar_lea.sflag [#allocation6], %s1771_s29 }
 0x576   : > { %p1946_p7 = pnand %p1951_p3, %p3183_p4 }
 0x578   : > { %2099 = dma.done.wait (!%p1946_p7), %s1772_s11, 512  }
 0x579   : > { %2101 = vsyncadd (!%p1946_p7), %s1772_s11, 4294966784  ;;  %p17_p8 = scmp.ge.s32.totalorder %s2190_s27, 4   ;;  %s3184_s21 = smov %s2108_s22 }
 0x57a   : > { %s3185_s22 = smov %s2112_s23  ;;  %s3186_s23 = smov %s2201_s30 }
 0x57b   : > { %s3187_s24 = smov %s2190_s27  ;;  %19 = sbr.rel (!%p17_p8) target bundleno = 4 (0x4), region = 104 }
 0x582   :  { %1777 = vsyncpa [#allocation5], 1 }
 0x583   :  { %1779 = vsyncpa [#allocation5 + $0x1], 1 }
 0x584   :  { %1780 = vsyncpa [#allocation6], 1 }
 0x585   :  { %1782 = vsyncpa [#allocation6 + $0x1], 1 }

</bundles_post_ra>
